<compile_context>
chip_gen: v6e
topology: v6e:2x2x1
jax: 0.10.0
libtpu: 0.0.40
codegen_flags: <defaults>
</compile_context>

<pallas_src>
import jax
import jax.numpy as jnp
from jax.experimental import pallas as pl
from jax.experimental.pallas import tpu as pltpu

SUB = 8      # sublanes per output block
LANE = 128   # lanes per output block


def mf_kernel(u_ref, i_ref, b_ref, out_ref):
    """One tile of T = SUB*lanes (user, item) pairs.

    u_ref, i_ref: (1, T, D) pre-gathered embedding rows (VMEM)
    b_ref:        (SUB, T//SUB) pre-summed user_bias + item_bias + mean (VMEM)
    out_ref:      (SUB, T//SUB) predictions (VMEM)
    """
    sub, lanes = out_ref.shape
    u = u_ref[0].astype(jnp.float32)                 # (T, D)
    v = i_ref[0].astype(jnp.float32)                 # (T, D)
    dots = jnp.sum(u * v, axis=-1)                   # (T,)
    out_ref[...] = dots.reshape(sub, lanes) + b_ref[...]


def mf_forward(src, dst, user_emb, user_bias, item_emb, item_bias, mean,
               *, block_pairs=2048):
    """Pallas-backed MF.forward. Returns (B,) float32 predictions."""
    B = int(src.shape[0])
    D = int(user_emb.shape[1])

    min_tile = SUB * LANE                             # 1024 pairs per block min
    # Tile size: multiple of 1024 so the (8, T//8) output block is
    # sublane- and lane-dense; capped for small batches.
    T = max(min_tile, (block_pairs // min_tile) * min_tile)
    T = min(T, -(-B // min_tile) * min_tile)
    n_tiles = -(-B // T)
    B_pad = n_tiles * T
    pad = B_pad - B

    # Pad indices with 0 (always a valid row); padded outputs are sliced off.
    src_p = jnp.pad(src.astype(jnp.int32), (0, pad))
    dst_p = jnp.pad(dst.astype(jnp.int32), (0, pad))

    # Pre-gather embedding rows densely in the wrapper (one fused XLA gather
    # per table); only the gathered rows (not the full tables) are cast to f32.
    u_rows = user_emb[src_p].astype(jnp.float32).reshape(n_tiles, T, D)
    i_rows = item_emb[dst_p].astype(jnp.float32).reshape(n_tiles, T, D)

    # Fold user bias + item bias + global mean into a single bias tile.
    bias = (user_bias[src_p, 0] + item_bias[dst_p, 0] + mean[0]).astype(jnp.float32)
    lanes = T // SUB
    bias_tiles = bias.reshape(n_tiles * SUB, lanes)

    out = pl.pallas_call(
        mf_kernel,
        out_shape=jax.ShapeDtypeStruct((n_tiles * SUB, lanes), jnp.float32),
        grid=(n_tiles,),
        in_specs=[
            pl.BlockSpec((1, T, D), lambda i: (i, 0, 0)),     # user rows tile
            pl.BlockSpec((1, T, D), lambda i: (i, 0, 0)),     # item rows tile
            pl.BlockSpec((SUB, lanes), lambda i: (i, 0)),     # folded bias tile
        ],
        out_specs=pl.BlockSpec((SUB, lanes), lambda i: (i, 0)),
        compiler_params=pltpu.CompilerParams(
            dimension_semantics=("parallel",)),               # independent tiles
    )(u_rows, i_rows, bias_tiles)

    return out.reshape(-1)[:B]


def xavier_uniform(key, shape):
    """torch.nn.init.xavier_uniform_ for a 2-D weight (fan_out, fan_in)."""
    fan_out, fan_in = shape
    bound = (6.0 / (fan_in + fan_out)) ** 0.5
    return jax.random.uniform(key, shape, jnp.float32, -bound, bound)


if __name__ == "__main__":
    # Small, deterministic setup consistent with MF.__init__
    num_users, num_items = 16, 24
    embedding_dim = 32
    batch = 8

    key = jax.random.PRNGKey(0)
    k_ue, k_ub, k_ie, k_ib, k_src, k_dst = jax.random.split(key, 6)

    user_emb = xavier_uniform(k_ue, (num_users, embedding_dim))
    user_bias = xavier_uniform(k_ub, (num_users, 1))
    item_emb = xavier_uniform(k_ie, (num_items, embedding_dim))
    item_bias = xavier_uniform(k_ib, (num_items, 1))
    mean = jnp.array([0.0], dtype=jnp.float32)   # nn.Parameter([mean]), not trained

    src = jax.random.randint(k_src, (batch,), 0, num_users, dtype=jnp.int32)
    dst = jax.random.randint(k_dst, (batch,), 0, num_items, dtype=jnp.int32)

    out = mf_forward(src, dst, user_emb, user_bias, item_emb, item_bias, mean)
    out = jax.block_until_ready(out)

    # Pure-JAX reference (mirrors the PyTorch forward exactly).
    ref = (jnp.sum(user_emb[src] * item_emb[dst], axis=1)
           + user_bias[src, 0] + item_bias[dst, 0] + mean[0])

    assert out.shape == (batch,), out.shape
    assert jnp.allclose(out, ref, atol=1e-5, rtol=1e-5), (out, ref)
    print("KERNEL_OK")
</pallas_src>

<mosaic_0001>
module attributes {stable_mosaic.version = 11 : i64} {
  func.func @mf_kernel(%arg0: i32, %arg1: memref<1x1024x32xf32, #tpu.memory_space<vmem>>, %arg2: memref<1x1024x32xf32, #tpu.memory_space<vmem>>, %arg3: memref<8x128xf32, #tpu.memory_space<vmem>>, %arg4: memref<8x128xf32, #tpu.memory_space<vmem>>) attributes {dimension_semantics = [#tpu.dimension_semantics<parallel>], iteration_bounds = array<i64: 1>, scalar_prefetch = 0 : i64, scratch_operands = 0 : i64, tpu.core_type = #tpu.core_type<tc>, window_params = [{transform_indices = @transform_0, window_bounds = array<i64: 1, 1024, 32>}, {transform_indices = @transform_1, window_bounds = array<i64: 1, 1024, 32>}, {transform_indices = @transform_2, window_bounds = array<i64: 8, 128>}, {transform_indices = @transform_3, window_bounds = array<i64: 8, 128>}]} {
    %c0 = arith.constant 0 : index
    %c0_0 = arith.constant 0 : index
    %c0_1 = arith.constant 0 : index
    %0 = vector.load %arg1[%c0, %c0_0, %c0_1] : memref<1x1024x32xf32, #tpu.memory_space<vmem>>, vector<1x1024x32xf32>
    %1 = vector.shape_cast %0 : vector<1x1024x32xf32> to vector<1024x32xf32>
    %c0_2 = arith.constant 0 : index
    %c0_3 = arith.constant 0 : index
    %c0_4 = arith.constant 0 : index
    %2 = vector.load %arg2[%c0_2, %c0_3, %c0_4] : memref<1x1024x32xf32, #tpu.memory_space<vmem>>, vector<1x1024x32xf32>
    %3 = vector.shape_cast %2 : vector<1x1024x32xf32> to vector<1024x32xf32>
    %4 = arith.mulf %1, %3 : vector<1024x32xf32>
    %cst = arith.constant dense<0.000000e+00> : vector<1024xf32>
    %5 = vector.multi_reduction <add>, %4, %cst [1] : vector<1024x32xf32> to vector<1024xf32>
    %6 = vector.shape_cast %5 : vector<1024xf32> to vector<8x128xf32>
    %c0_5 = arith.constant 0 : index
    %c0_6 = arith.constant 0 : index
    %7 = vector.load %arg3[%c0_5, %c0_6] : memref<8x128xf32, #tpu.memory_space<vmem>>, vector<8x128xf32>
    %8 = arith.addf %6, %7 : vector<8x128xf32>
    %c0_7 = arith.constant 0 : index
    %c0_8 = arith.constant 0 : index
    %9 = vector.load %arg4[%c0_7, %c0_8] : memref<8x128xf32, #tpu.memory_space<vmem>>, vector<8x128xf32>
    tpu.vector_store %arg4[%c0_7, %c0_8], %8 {strides = array<i32>} : memref<8x128xf32, #tpu.memory_space<vmem>>, vector<8x128xf32>,
    return
  }
  func.func @transform_0(%arg0: i32) -> (i32, i32, i32) {
    %c0_i32 = arith.constant 0 : i32
    %c0_i32_0 = arith.constant 0 : i32
    %c0_i32_1 = arith.constant 0 : i32
    return %arg0, %c0_i32, %c0_i32_0 : i32, i32, i32
  }
  func.func @transform_1(%arg0: i32) -> (i32, i32, i32) {
    %c0_i32 = arith.constant 0 : i32
    %c0_i32_0 = arith.constant 0 : i32
    %c0_i32_1 = arith.constant 0 : i32
    return %arg0, %c0_i32, %c0_i32_0 : i32, i32, i32
  }
  func.func @transform_2(%arg0: i32) -> (i32, i32) {
    %c0_i32 = arith.constant 0 : i32
    %c0_i32_0 = arith.constant 0 : i32
    return %arg0, %c0_i32 : i32, i32
  }
  func.func @transform_3(%arg0: i32) -> (i32, i32) {
    %c0_i32 = arith.constant 0 : i32
    %c0_i32_0 = arith.constant 0 : i32
    return %arg0, %c0_i32 : i32, i32
  }
}

</mosaic_0001>

<bundles_post_ra>
// kernel: tpu_custom_call.1
= control target key start
LH: loop header
LB: loop body
LE: loop exit
PB: predicated region body
PF: predicated region fallthrough
CT: control target
= control target key end

     0   :  { %vm399_vm0 = vcmask 261120   ;;  %s4898_s0 = inlined_call_operand.vmem [shape: f32[1,1024,32], index: 0, kind: input, shape index: {}]   ;;  %s4899_s1 = inlined_call_operand.vmem [shape: f32[1,1024,32], index: 1, kind: input, shape index: {}]   ;;  %s4900_s2 = inlined_call_operand.vmem [shape: f32[8,128], index: 2, kind: input, shape index: {}]   ;;  %s4901_s3 = inlined_call_operand.hbm [shape: f32[8,128], index: 3, kind: output, shape index: {}]  }
   0x1   :  { %v17_v0 = vld [vmem:[%s4898_s0 + $0x10] sm:$0xff]  ;;  %v15_v2 = vld [vmem:[%s4898_s0] sm:$0xff]  ;;  %v18_v5 = vld [vmem:[%s4898_s0 + $0x18] sm:$0xff] }
   0x2   :  { %v145_v1 = vld [vmem:[%s4899_s1 + $0x10] sm:$0xff]  ;;  %v143_v4 = vld [vmem:[%s4899_s1] sm:$0xff]  ;;  %v146_v6 = vld [vmem:[%s4899_s1 + $0x18] sm:$0xff] }
   0x3   :  { %v273_v3 = vmul.f32 %v145_v1, %v17_v0  ;;  %v271_v7 = vmul.f32 %v143_v4, %v15_v2  ;;  %v274_v8 = vmul.f32 %v146_v6, %v18_v5  ;;  %v16_v9 = vld [vmem:[%s4898_s0 + $0x8] sm:$0xff]  ;;  %v19_v15 = vld [vmem:[%s4898_s0 + $0x20] sm:$0xff]  ;;  %v22_v22 = vld [vmem:[%s4898_s0 + $0x38] sm:$0xff] }
   0x4   :  { %v144_v10 = vld [vmem:[%s4899_s1 + $0x8] sm:$0xff]  ;;  %v147_v16 = vld [vmem:[%s4899_s1 + $0x20] sm:$0xff]  ;;  %v150_v23 = vld [vmem:[%s4899_s1 + $0x38] sm:$0xff] }
   0x5   :  { %v20_v11 = vld [vmem:[%s4898_s0 + $0x28] sm:$0xff]  ;;  %v406_v12 = vsel %vm399_vm0, %v273_v3, 0.0  ;;  %v272_v13 = vmul.f32 %v144_v10, %v16_v9  ;;  %v400_v17 = vsel %vm399_vm0, %v271_v7, 0.0  ;;  %v409_v18 = vsel %vm399_vm0, %v274_v8, 0.0  ;;  %v21_v24 = vld [vmem:[%s4898_s0 + $0x30] sm:$0xff]  ;;  %v23_v32 = vld [vmem:[%s4898_s0 + $0x40] sm:$0xff] }
   0x6   :  { %v148_v14 = vld [vmem:[%s4899_s1 + $0x28] sm:$0xff]  ;;  %407 = vadd.xlane.f32.xlu1 %v406_v12  ;;  %401 = vadd.xlane.f32.xlu0 %v400_v17  ;;  %v275_v21 = vmul.f32 %v147_v16, %v19_v15  ;;  %v149_v25 = vld [vmem:[%s4899_s1 + $0x30] sm:$0xff]  ;;  %v278_v27 = vmul.f32 %v150_v23, %v22_v22  ;;  %v151_v33 = vld [vmem:[%s4899_s1 + $0x40] sm:$0xff] }
   0x7   :  { %v276_v19 = vmul.f32 %v148_v14, %v20_v11  ;;  %v403_v20 = vsel %vm399_vm0, %v272_v13, 0.0  ;;  %v277_v29 = vmul.f32 %v149_v25, %v21_v24  ;;  %v24_v30 = vld [vmem:[%s4898_s0 + $0x48] sm:$0xff]  ;;  %v279_v37 = vmul.f32 %v151_v33, %v23_v32  ;;  %v26_v38 = vld [vmem:[%s4898_s0 + $0x58] sm:$0xff]  ;;  %v25_v40 = vld [vmem:[%s4898_s0 + $0x50] sm:$0xff] }
   0x8   :  { %v412_v28 = vsel %vm399_vm0, %v275_v21, 0.0  ;;  %v152_v31 = vld [vmem:[%s4899_s1 + $0x48] sm:$0xff]  ;;  %v421_v34 = vsel %vm399_vm0, %v278_v27, 0.0  ;;  %v154_v39 = vld [vmem:[%s4899_s1 + $0x58] sm:$0xff]  ;;  %v153_v41 = vld [vmem:[%s4899_s1 + $0x50] sm:$0xff] }
   0x9   :  { %v415_v26 = vsel %vm399_vm0, %v276_v19, 0.0  ;;  %v280_v35 = vmul.f32 %v152_v31, %v24_v30  ;;  %v418_v36 = vsel %vm399_vm0, %v277_v29, 0.0  ;;  %v282_v43 = vmul.f32 %v154_v39, %v26_v38  ;;  %v28_v46 = vld [vmem:[%s4898_s0 + $0x68] sm:$0xff]  ;;  %v27_v48 = vld [vmem:[%s4898_s0 + $0x60] sm:$0xff]  ;;  %v30_v54 = vld [vmem:[%s4898_s0 + $0x78] sm:$0xff] }
   0xa   :  { %410 = vadd.xlane.f32.xlu1 %v409_v18  ;;  %404 = vadd.xlane.f32.xlu0 %v403_v20  ;;  %v424_v44 = vsel %vm399_vm0, %v279_v37, 0.0  ;;  %v281_v45 = vmul.f32 %v153_v41, %v25_v40  ;;  %v156_v47 = vld [vmem:[%s4899_s1 + $0x68] sm:$0xff]  ;;  %v155_v49 = vld [vmem:[%s4899_s1 + $0x60] sm:$0xff]  ;;  %v158_v55 = vld [vmem:[%s4899_s1 + $0x78] sm:$0xff] }
   0xb   :  { %v427_v42 = vsel %vm399_vm0, %v280_v35, 0.0  ;;  %v433_v50 = vsel %vm399_vm0, %v282_v43, 0.0  ;;  %v284_v51 = vmul.f32 %v156_v47, %v28_v46  ;;  %v283_v53 = vmul.f32 %v155_v49, %v27_v48  ;;  %v29_v56 = vld [vmem:[%s4898_s0 + $0x70] sm:$0xff]  ;;  %v32_v62 = vld [vmem:[%s4898_s0 + $0x88] sm:$0xff]  ;;  %v31_v0 = vld [vmem:[%s4898_s0 + $0x80] sm:$0xff] }
   0xc   :  { %v430_v52 = vsel %vm399_vm0, %v281_v45, 0.0  ;;  %v157_v57 = vld [vmem:[%s4899_s1 + $0x70] sm:$0xff]  ;;  %v286_v59 = vmul.f32 %v158_v55, %v30_v54  ;;  %v160_v63 = vld [vmem:[%s4899_s1 + $0x88] sm:$0xff]  ;;  %v159_v1 = vld [vmem:[%s4899_s1 + $0x80] sm:$0xff] }
   0xd   :  { %v439_v58 = vsel %vm399_vm0, %v284_v51, 0.0  ;;  %v436_v60 = vsel %vm399_vm0, %v283_v53, 0.0  ;;  %v285_v61 = vmul.f32 %v157_v57, %v29_v56  ;;  %v288_v3 = vmul.f32 %v160_v63, %v32_v62  ;;  %v34_v6 = vld [vmem:[%s4898_s0 + $0x98] sm:$0xff]  ;;  %v33_v8 = vld [vmem:[%s4898_s0 + $0x90] sm:$0xff]  ;;  %v36_v14 = vld [vmem:[%s4898_s0 + $0xa8] sm:$0xff] }
   0xe   :  { %416 = vadd.xlane.f32.xlu1 %v415_v26  ;;  %413 = vadd.xlane.f32.xlu0 %v412_v28  ;;  %v445_v2 = vsel %vm399_vm0, %v286_v59, 0.0  ;;  %v287_v5 = vmul.f32 %v159_v1, %v31_v0  ;;  %v162_v7 = vld [vmem:[%s4899_s1 + $0x98] sm:$0xff]  ;;  %v161_v9 = vld [vmem:[%s4899_s1 + $0x90] sm:$0xff]  ;;  %v164_v15 = vld [vmem:[%s4899_s1 + $0xa8] sm:$0xff] }
   0xf   :  { %v442_v4 = vsel %vm399_vm0, %v285_v61, 0.0  ;;  %v451_v10 = vsel %vm399_vm0, %v288_v3, 0.0  ;;  %v290_v11 = vmul.f32 %v162_v7, %v34_v6  ;;  %v289_v13 = vmul.f32 %v161_v9, %v33_v8  ;;  %v35_v16 = vld [vmem:[%s4898_s0 + $0xa0] sm:$0xff]  ;;  %v38_v22 = vld [vmem:[%s4898_s0 + $0xb8] sm:$0xff]  ;;  %v37_v24 = vld [vmem:[%s4898_s0 + $0xb0] sm:$0xff] }
  0x10   :  { %v448_v12 = vsel %vm399_vm0, %v287_v5, 0.0  ;;  %v163_v17 = vld [vmem:[%s4899_s1 + $0xa0] sm:$0xff]  ;;  %v292_v19 = vmul.f32 %v164_v15, %v36_v14  ;;  %v166_v23 = vld [vmem:[%s4899_s1 + $0xb8] sm:$0xff]  ;;  %v165_v25 = vld [vmem:[%s4899_s1 + $0xb0] sm:$0xff] }
  0x11   :  { %v457_v18 = vsel %vm399_vm0, %v290_v11, 0.0  ;;  %v454_v20 = vsel %vm399_vm0, %v289_v13, 0.0  ;;  %v291_v21 = vmul.f32 %v163_v17, %v35_v16  ;;  %v294_v27 = vmul.f32 %v166_v23, %v38_v22  ;;  %v40_v30 = vld [vmem:[%s4898_s0 + $0xc8] sm:$0xff]  ;;  %v39_v32 = vld [vmem:[%s4898_s0 + $0xc0] sm:$0xff]  ;;  %v42_v38 = vld [vmem:[%s4898_s0 + $0xd8] sm:$0xff] }
  0x12   :  { %422 = vadd.xlane.f32.xlu1 %v421_v34  ;;  %419 = vadd.xlane.f32.xlu0 %v418_v36  ;;  %v463_v26 = vsel %vm399_vm0, %v292_v19, 0.0  ;;  %v293_v29 = vmul.f32 %v165_v25, %v37_v24  ;;  %v168_v31 = vld [vmem:[%s4899_s1 + $0xc8] sm:$0xff]  ;;  %v167_v33 = vld [vmem:[%s4899_s1 + $0xc0] sm:$0xff]  ;;  %v170_v39 = vld [vmem:[%s4899_s1 + $0xd8] sm:$0xff] }
  0x13   :  { %v460_v28 = vsel %vm399_vm0, %v291_v21, 0.0  ;;  %v469_v34 = vsel %vm399_vm0, %v294_v27, 0.0  ;;  %v296_v35 = vmul.f32 %v168_v31, %v40_v30  ;;  %v295_v37 = vmul.f32 %v167_v33, %v39_v32  ;;  %v41_v40 = vld [vmem:[%s4898_s0 + $0xd0] sm:$0xff]  ;;  %v44_v46 = vld [vmem:[%s4898_s0 + $0xe8] sm:$0xff]  ;;  %v43_v48 = vld [vmem:[%s4898_s0 + $0xe0] sm:$0xff] }
  0x14   :  { %v466_v36 = vsel %vm399_vm0, %v293_v29, 0.0  ;;  %v169_v41 = vld [vmem:[%s4899_s1 + $0xd0] sm:$0xff]  ;;  %v298_v43 = vmul.f32 %v170_v39, %v42_v38  ;;  %v172_v47 = vld [vmem:[%s4899_s1 + $0xe8] sm:$0xff]  ;;  %v171_v49 = vld [vmem:[%s4899_s1 + $0xe0] sm:$0xff] }
  0x15   :  { %v297_v45 = vmul.f32 %v169_v41, %v41_v40  ;;  %v300_v51 = vmul.f32 %v172_v47, %v44_v46  ;;  %v299_v53 = vmul.f32 %v171_v49, %v43_v48  ;;  %v46_v54 = vld [vmem:[%s4898_s0 + $0xf8] sm:$0xff]  ;;  %v45_v56 = vld [vmem:[%s4898_s0 + $0xf0] sm:$0xff]  ;;  %v48_v62 = vld [vmem:[%s4898_s0 + $0x108] sm:$0xff] }
  0x16   :  { %428 = vadd.xlane.f32.xlu1 %v427_v42  ;;  %425 = vadd.xlane.f32.xlu0 %v424_v44  ;;  %v475_v42 = vsel %vm399_vm0, %v296_v35, 0.0  ;;  %v472_v44 = vsel %vm399_vm0, %v295_v37, 0.0  ;;  %v174_v55 = vld [vmem:[%s4899_s1 + $0xf8] sm:$0xff]  ;;  %v173_v57 = vld [vmem:[%s4899_s1 + $0xf0] sm:$0xff]  ;;  %v176_v63 = vld [vmem:[%s4899_s1 + $0x108] sm:$0xff] }
  0x17   :  { %v302_v59 = vmul.f32 %v174_v55, %v46_v54  ;;  %v301_v61 = vmul.f32 %v173_v57, %v45_v56  ;;  %v47_v0 = vld [vmem:[%s4898_s0 + $0x100] sm:$0xff]  ;;  %v304_v3 = vmul.f32 %v176_v63, %v48_v62  ;;  %v50_v6 = vld [vmem:[%s4898_s0 + $0x118] sm:$0xff]  ;;  %v49_v8 = vld [vmem:[%s4898_s0 + $0x110] sm:$0xff] }
  0x18   :  { %v175_v1 = vld [vmem:[%s4899_s1 + $0x100] sm:$0xff]  ;;  %v178_v7 = vld [vmem:[%s4899_s1 + $0x118] sm:$0xff]  ;;  %v177_v9 = vld [vmem:[%s4899_s1 + $0x110] sm:$0xff] }
  0x19   :  { %v303_v5 = vmul.f32 %v175_v1, %v47_v0 }
  0x1a   :  { %434 = vadd.xlane.f32.xlu1 %v433_v50  ;;  %431 = vadd.xlane.f32.xlu0 %v430_v52  ;;  %v481_v50 = vsel %vm399_vm0, %v298_v43, 0.0  ;;  %v478_v52 = vsel %vm399_vm0, %v297_v45, 0.0 }
  0x1e   :  { %440 = vadd.xlane.f32.xlu1 %v439_v58  ;;  %437 = vadd.xlane.f32.xlu0 %v436_v60  ;;  %v487_v58 = vsel %vm399_vm0, %v300_v51, 0.0  ;;  %v484_v60 = vsel %vm399_vm0, %v299_v53, 0.0 }
  0x22   :  { %446 = vadd.xlane.f32.xlu1 %v445_v2  ;;  %443 = vadd.xlane.f32.xlu0 %v442_v4  ;;  %v493_v2 = vsel %vm399_vm0, %v302_v59, 0.0  ;;  %v490_v4 = vsel %vm399_vm0, %v301_v61, 0.0 }
  0x26   :  { %452 = vadd.xlane.f32.xlu1 %v451_v10  ;;  %449 = vadd.xlane.f32.xlu0 %v448_v12 }
  0x2a   :  { %458 = vadd.xlane.f32.xlu1 %v457_v18  ;;  %455 = vadd.xlane.f32.xlu0 %v454_v20 }
  0x2e   :  { %464 = vadd.xlane.f32.xlu1 %v463_v26  ;;  %461 = vadd.xlane.f32.xlu0 %v460_v28 }
  0x32   :  { %470 = vadd.xlane.f32.xlu1 %v469_v34  ;;  %467 = vadd.xlane.f32.xlu0 %v466_v36 }
  0x36   :  { %476 = vadd.xlane.f32.xlu1 %v475_v42  ;;  %473 = vadd.xlane.f32.xlu0 %v472_v44 }
  0x3a   :  { %482 = vadd.xlane.f32.xlu1 %v481_v50  ;;  %479 = vadd.xlane.f32.xlu0 %v478_v52 }
  0x3e   :  { %488 = vadd.xlane.f32.xlu1 %v487_v58  ;;  %485 = vadd.xlane.f32.xlu0 %v484_v60 }
  0x42   :  { %494 = vadd.xlane.f32.xlu1 %v493_v2 }
  0x43   :  { %8 = vsyncpa [#allocation3], 0  ;;  %491 = vadd.xlane.f32.xlu0 %v490_v4  ;;  %v499_v10 = vsel %vm399_vm0, %v304_v3, 0.0  ;;  %v306_v11 = vmul.f32 %v178_v7, %v50_v6  ;;  %v496_v12 = vsel %vm399_vm0, %v303_v5, 0.0  ;;  %v305_v13 = vmul.f32 %v177_v9, %v49_v8  ;;  %v52_v14 = vld [vmem:[%s4898_s0 + $0x128] sm:$0xff]  ;;  %v51_v16 = vld [vmem:[%s4898_s0 + $0x120] sm:$0xff] }
  0x44   :  { %v180_v15 = vld [vmem:[%s4899_s1 + $0x128] sm:$0xff]  ;;  %v179_v17 = vld [vmem:[%s4899_s1 + $0x120] sm:$0xff]  ;;  %v54_v22 = vld [vmem:[%s4898_s0 + $0x138] sm:$0xff]  ;;  %vm2101_vm1 = vcmask 130112   ;;  %vm2108_vm2 = vcmask 195712   ;;  %vm2115_vm3 = vcmask 261312  }
  0x45   :  { %v505_v18 = vsel %vm399_vm0, %v306_v11, 0.0  ;;  %v308_v19 = vmul.f32 %v180_v15, %v52_v14  ;;  %v502_v20 = vsel %vm399_vm0, %v305_v13, 0.0  ;;  %v307_v21 = vmul.f32 %v179_v17, %v51_v16  ;;  %v182_v23 = vld [vmem:[%s4899_s1 + $0x138] sm:$0xff]  ;;  %v53_v24 = vld [vmem:[%s4898_s0 + $0x130] sm:$0xff]  ;;  %v56_v30 = vld [vmem:[%s4898_s0 + $0x148] sm:$0xff] }
  0x46   :  { %500 = vadd.xlane.f32.xlu1 %v499_v10  ;;  %v181_v25 = vld [vmem:[%s4899_s1 + $0x130] sm:$0xff]  ;;  %v310_v27 = vmul.f32 %v182_v23, %v54_v22  ;;  %v184_v31 = vld [vmem:[%s4899_s1 + $0x148] sm:$0xff]  ;;  %v55_v32 = vld [vmem:[%s4898_s0 + $0x140] sm:$0xff]  ;;  %vm2122_vm4 = vcmask 326912   ;;  %vm2129_vm5 = vcmask 392512   ;;  %vm2136_vm6 = vcmask 458112  }
  0x47   :  { %497 = vadd.xlane.f32.xlu0 %v496_v12  ;;  %v511_v26 = vsel %vm399_vm0, %v308_v19, 0.0  ;;  %v508_v28 = vsel %vm399_vm0, %v307_v21, 0.0  ;;  %v309_v29 = vmul.f32 %v181_v25, %v53_v24  ;;  %v183_v33 = vld [vmem:[%s4899_s1 + $0x140] sm:$0xff]  ;;  %v312_v35 = vmul.f32 %v184_v31, %v56_v30  ;;  %v58_v38 = vld [vmem:[%s4898_s0 + $0x158] sm:$0xff]  ;;  %v57_v40 = vld [vmem:[%s4898_s0 + $0x150] sm:$0xff] }
  0x48   :  { %v517_v34 = vsel %vm399_vm0, %v310_v27, 0.0  ;;  %v311_v37 = vmul.f32 %v183_v33, %v55_v32  ;;  %v186_v39 = vld [vmem:[%s4899_s1 + $0x158] sm:$0xff]  ;;  %v185_v41 = vld [vmem:[%s4899_s1 + $0x150] sm:$0xff]  ;;  %v60_v46 = vld [vmem:[%s4898_s0 + $0x168] sm:$0xff]  ;;  %vm2143_vm7 = vcmask 523712   ;;  %vm2150_vm8 = vcmask 589312  }
  0x49   :  { %v514_v36 = vsel %vm399_vm0, %v309_v29, 0.0  ;;  %v523_v42 = vsel %vm399_vm0, %v312_v35, 0.0  ;;  %v314_v43 = vmul.f32 %v186_v39, %v58_v38  ;;  %v313_v45 = vmul.f32 %v185_v41, %v57_v40  ;;  %v188_v47 = vld [vmem:[%s4899_s1 + $0x168] sm:$0xff]  ;;  %v59_v48 = vld [vmem:[%s4898_s0 + $0x160] sm:$0xff]  ;;  %v62_v54 = vld [vmem:[%s4898_s0 + $0x178] sm:$0xff] }
  0x4a   :  { %506 = vadd.xlane.f32.xlu1 %v505_v18  ;;  %v520_v44 = vsel %vm399_vm0, %v311_v37, 0.0  ;;  %v187_v49 = vld [vmem:[%s4899_s1 + $0x160] sm:$0xff]  ;;  %v316_v51 = vmul.f32 %v188_v47, %v60_v46  ;;  %v190_v55 = vld [vmem:[%s4899_s1 + $0x178] sm:$0xff]  ;;  %v61_v56 = vld [vmem:[%s4898_s0 + $0x170] sm:$0xff]  ;;  %vm2157_vm9 = vcmask 654912   ;;  %vm2164_vm10 = vcmask 720512  }
  0x4b   :  { %503 = vadd.xlane.f32.xlu0 %v502_v20  ;;  %v529_v50 = vsel %vm399_vm0, %v314_v43, 0.0  ;;  %v526_v52 = vsel %vm399_vm0, %v313_v45, 0.0  ;;  %v315_v53 = vmul.f32 %v187_v49, %v59_v48  ;;  %v189_v57 = vld [vmem:[%s4899_s1 + $0x170] sm:$0xff]  ;;  %v318_v59 = vmul.f32 %v190_v55, %v62_v54  ;;  %v64_v62 = vld [vmem:[%s4898_s0 + $0x188] sm:$0xff]  ;;  %v63_v0 = vld [vmem:[%s4898_s0 + $0x180] sm:$0xff] }
  0x4c   :  { %v535_v58 = vsel %vm399_vm0, %v316_v51, 0.0  ;;  %v317_v61 = vmul.f32 %v189_v57, %v61_v56  ;;  %v192_v63 = vld [vmem:[%s4899_s1 + $0x188] sm:$0xff]  ;;  %v191_v1 = vld [vmem:[%s4899_s1 + $0x180] sm:$0xff]  ;;  %v66_v6 = vld [vmem:[%s4898_s0 + $0x198] sm:$0xff]  ;;  %vm2171_vm11 = vcmask 786112   ;;  %vm4905_vm12 = vcmask 851712  }
  0x4d   :  { %v532_v60 = vsel %vm399_vm0, %v315_v53, 0.0  ;;  %v541_v2 = vsel %vm399_vm0, %v318_v59, 0.0  ;;  %v320_v3 = vmul.f32 %v192_v63, %v64_v62  ;;  %v319_v5 = vmul.f32 %v191_v1, %v63_v0  ;;  %v194_v7 = vld [vmem:[%s4899_s1 + $0x198] sm:$0xff]  ;;  %v65_v8 = vld [vmem:[%s4898_s0 + $0x190] sm:$0xff]  ;;  %v68_v14 = vld [vmem:[%s4898_s0 + $0x1a8] sm:$0xff] }
  0x4e   :  { %512 = vadd.xlane.f32.xlu1 %v511_v26  ;;  %v538_v4 = vsel %vm399_vm0, %v317_v61, 0.0  ;;  %v193_v9 = vld [vmem:[%s4899_s1 + $0x190] sm:$0xff]  ;;  %v322_v11 = vmul.f32 %v194_v7, %v66_v6  ;;  %v196_v15 = vld [vmem:[%s4899_s1 + $0x1a8] sm:$0xff]  ;;  %v67_v16 = vld [vmem:[%s4898_s0 + $0x1a0] sm:$0xff]  ;;  %vm2185_vm13 = vcmask 917312   ;;  %vm2192_vm14 = vcmask 982912  }
  0x4f   :  { %509 = vadd.xlane.f32.xlu0 %v508_v28  ;;  %v547_v10 = vsel %vm399_vm0, %v320_v3, 0.0  ;;  %v544_v12 = vsel %vm399_vm0, %v319_v5, 0.0  ;;  %v321_v13 = vmul.f32 %v193_v9, %v65_v8  ;;  %v195_v17 = vld [vmem:[%s4899_s1 + $0x1a0] sm:$0xff]  ;;  %v324_v19 = vmul.f32 %v196_v15, %v68_v14  ;;  %v70_v22 = vld [vmem:[%s4898_s0 + $0x1b8] sm:$0xff]  ;;  %v69_v24 = vld [vmem:[%s4898_s0 + $0x1b0] sm:$0xff] }
  0x50   :  { %v553_v18 = vsel %vm399_vm0, %v322_v11, 0.0  ;;  %v323_v21 = vmul.f32 %v195_v17, %v67_v16  ;;  %v198_v23 = vld [vmem:[%s4899_s1 + $0x1b8] sm:$0xff]  ;;  %v197_v25 = vld [vmem:[%s4899_s1 + $0x1b0] sm:$0xff]  ;;  %v72_v30 = vld [vmem:[%s4898_s0 + $0x1c8] sm:$0xff]  ;;  %vm2199_vm15 = vcmask 1048512  }
  0x51   :  { %v550_v20 = vsel %vm399_vm0, %v321_v13, 0.0  ;;  %v559_v26 = vsel %vm399_vm0, %v324_v19, 0.0  ;;  %v326_v27 = vmul.f32 %v198_v23, %v70_v22  ;;  %v325_v29 = vmul.f32 %v197_v25, %v69_v24  ;;  %v200_v31 = vld [vmem:[%s4899_s1 + $0x1c8] sm:$0xff]  ;;  %v71_v32 = vld [vmem:[%s4898_s0 + $0x1c0] sm:$0xff]  ;;  %v74_v38 = vld [vmem:[%s4898_s0 + $0x1d8] sm:$0xff] }
  0x52   :  { %518 = vadd.xlane.f32.xlu1 %v517_v34  ;;  %v556_v28 = vsel %vm399_vm0, %v323_v21, 0.0  ;;  %v199_v33 = vld [vmem:[%s4899_s1 + $0x1c0] sm:$0xff]  ;;  %v328_v35 = vmul.f32 %v200_v31, %v72_v30  ;;  %v202_v39 = vld [vmem:[%s4899_s1 + $0x1d8] sm:$0xff]  ;;  %v73_v40 = vld [vmem:[%s4898_s0 + $0x1d0] sm:$0xff] }
  0x53   :  { %515 = vadd.xlane.f32.xlu0 %v514_v36  ;;  %v565_v34 = vsel %vm399_vm0, %v326_v27, 0.0  ;;  %v562_v36 = vsel %vm399_vm0, %v325_v29, 0.0  ;;  %v327_v37 = vmul.f32 %v199_v33, %v71_v32  ;;  %v201_v41 = vld [vmem:[%s4899_s1 + $0x1d0] sm:$0xff]  ;;  %v330_v43 = vmul.f32 %v202_v39, %v74_v38  ;;  %v76_v46 = vld [vmem:[%s4898_s0 + $0x1e8] sm:$0xff]  ;;  %v75_v48 = vld [vmem:[%s4898_s0 + $0x1e0] sm:$0xff] }
  0x54   :  { %v329_v45 = vmul.f32 %v201_v41, %v73_v40  ;;  %v204_v47 = vld [vmem:[%s4899_s1 + $0x1e8] sm:$0xff]  ;;  %v203_v49 = vld [vmem:[%s4899_s1 + $0x1e0] sm:$0xff]  ;;  %v78_v54 = vld [vmem:[%s4898_s0 + $0x1f8] sm:$0xff] }
  0x55   :  { %v332_v51 = vmul.f32 %v204_v47, %v76_v46  ;;  %v331_v53 = vmul.f32 %v203_v49, %v75_v48  ;;  %v206_v55 = vld [vmem:[%s4899_s1 + $0x1f8] sm:$0xff]  ;;  %v77_v56 = vld [vmem:[%s4898_s0 + $0x1f0] sm:$0xff]  ;;  %v80_v62 = vld [vmem:[%s4898_s0 + $0x208] sm:$0xff] }
  0x56   :  { %524 = vadd.xlane.f32.xlu1 %v523_v42  ;;  %v571_v42 = vsel %vm399_vm0, %v328_v35, 0.0  ;;  %v205_v57 = vld [vmem:[%s4899_s1 + $0x1f0] sm:$0xff]  ;;  %v334_v59 = vmul.f32 %v206_v55, %v78_v54  ;;  %v208_v63 = vld [vmem:[%s4899_s1 + $0x208] sm:$0xff]  ;;  %v79_v0 = vld [vmem:[%s4898_s0 + $0x200] sm:$0xff] }
  0x57   :  { %521 = vadd.xlane.f32.xlu0 %v520_v44  ;;  %v568_v44 = vsel %vm399_vm0, %v327_v37, 0.0  ;;  %v333_v61 = vmul.f32 %v205_v57, %v77_v56  ;;  %v207_v1 = vld [vmem:[%s4899_s1 + $0x200] sm:$0xff]  ;;  %v336_v3 = vmul.f32 %v208_v63, %v80_v62  ;;  %v82_v6 = vld [vmem:[%s4898_s0 + $0x218] sm:$0xff]  ;;  %v81_v8 = vld [vmem:[%s4898_s0 + $0x210] sm:$0xff] }
  0x58   :  { %v335_v5 = vmul.f32 %v207_v1, %v79_v0  ;;  %v210_v7 = vld [vmem:[%s4899_s1 + $0x218] sm:$0xff]  ;;  %v209_v9 = vld [vmem:[%s4899_s1 + $0x210] sm:$0xff]  ;;  %v84_v14 = vld [vmem:[%s4898_s0 + $0x228] sm:$0xff] }
  0x59   :  { %v338_v11 = vmul.f32 %v210_v7, %v82_v6  ;;  %v337_v13 = vmul.f32 %v209_v9, %v81_v8  ;;  %v212_v15 = vld [vmem:[%s4899_s1 + $0x228] sm:$0xff]  ;;  %v83_v16 = vld [vmem:[%s4898_s0 + $0x220] sm:$0xff]  ;;  %v86_v22 = vld [vmem:[%s4898_s0 + $0x238] sm:$0xff] }
  0x5a   :  { %530 = vadd.xlane.f32.xlu1 %v529_v50  ;;  %v577_v50 = vsel %vm399_vm0, %v330_v43, 0.0  ;;  %v211_v17 = vld [vmem:[%s4899_s1 + $0x220] sm:$0xff]  ;;  %v340_v19 = vmul.f32 %v212_v15, %v84_v14  ;;  %v214_v23 = vld [vmem:[%s4899_s1 + $0x238] sm:$0xff]  ;;  %v85_v24 = vld [vmem:[%s4898_s0 + $0x230] sm:$0xff] }
  0x5b   :  { %527 = vadd.xlane.f32.xlu0 %v526_v52  ;;  %v574_v52 = vsel %vm399_vm0, %v329_v45, 0.0  ;;  %v339_v21 = vmul.f32 %v211_v17, %v83_v16  ;;  %v213_v25 = vld [vmem:[%s4899_s1 + $0x230] sm:$0xff]  ;;  %v342_v27 = vmul.f32 %v214_v23, %v86_v22  ;;  %v88_v30 = vld [vmem:[%s4898_s0 + $0x248] sm:$0xff]  ;;  %v87_v32 = vld [vmem:[%s4898_s0 + $0x240] sm:$0xff] }
  0x5c   :  { %v341_v29 = vmul.f32 %v213_v25, %v85_v24  ;;  %v216_v31 = vld [vmem:[%s4899_s1 + $0x248] sm:$0xff]  ;;  %v215_v33 = vld [vmem:[%s4899_s1 + $0x240] sm:$0xff]  ;;  %v90_v40 = vld [vmem:[%s4898_s0 + $0x258] sm:$0xff] }
  0x5d   :  { %v613_v35 = vsel %vm399_vm0, %v342_v27, 0.0  ;;  %v343_v39 = vmul.f32 %v215_v33, %v87_v32  ;;  %v218_v41 = vld [vmem:[%s4899_s1 + $0x258] sm:$0xff]  ;;  %v217_v43 = vld [vmem:[%s4899_s1 + $0x250] sm:$0xff]  ;;  %v96_v6 = vld [vmem:[%s4898_s0 + $0x288] sm:$0xff] }
  0x5e   :  { %536 = vadd.xlane.f32.xlu1 %v535_v58  ;;  %v583_v58 = vsel %vm399_vm0, %v332_v51, 0.0  ;;  %v610_v38 = vsel %vm399_vm0, %v341_v29, 0.0  ;;  %v346_v46 = vmul.f32 %v218_v41, %v90_v40  ;;  %v220_v51 = vld [vmem:[%s4899_s1 + $0x268] sm:$0xff]  ;;  %v93_v62 = vld [vmem:[%s4898_s0 + $0x270] sm:$0xff]  ;;  %v95_v8 = vld [vmem:[%s4898_s0 + $0x280] sm:$0xff] }
  0x5f   :  { %533 = vadd.xlane.f32.xlu0 %v532_v60  ;;  %v580_v60 = vsel %vm399_vm0, %v331_v53, 0.0  ;;  %v616_v48 = vsel %vm399_vm0, %v343_v39, 0.0  ;;  %v219_v53 = vld [vmem:[%s4899_s1 + $0x260] sm:$0xff]  ;;  %v221_v63 = vld [vmem:[%s4899_s1 + $0x270] sm:$0xff]  ;;  %v224_v7 = vld [vmem:[%s4899_s1 + $0x288] sm:$0xff] }
  0x60   :  { %v625_v55 = vsel %vm399_vm0, %v346_v46, 0.0  ;;  %v223_v9 = vld [vmem:[%s4899_s1 + $0x280] sm:$0xff]  ;;  %v98_v16 = vld [vmem:[%s4898_s0 + $0x298] sm:$0xff]  ;;  %v228_v27 = vld [vmem:[%s4899_s1 + $0x2a8] sm:$0xff] }
  0x61   :  { %v351_v15 = vmul.f32 %v223_v9, %v95_v8  ;;  %v226_v17 = vld [vmem:[%s4899_s1 + $0x298] sm:$0xff]  ;;  %v227_v29 = vld [vmem:[%s4899_s1 + $0x2a0] sm:$0xff]  ;;  %v101_v40 = vld [vmem:[%s4898_s0 + $0x2b0] sm:$0xff] }
  0x62   :  { %542 = vadd.xlane.f32.xlu1 %v541_v2  ;;  %v589_v2 = vsel %vm399_vm0, %v334_v59, 0.0  ;;  %v354_v22 = vmul.f32 %v226_v17, %v98_v16  ;;  %v230_v39 = vld [vmem:[%s4899_s1 + $0x2b8] sm:$0xff]  ;;  %v229_v41 = vld [vmem:[%s4899_s1 + $0x2b0] sm:$0xff] }
  0x63   :  { %539 = vadd.xlane.f32.xlu0 %v538_v4  ;;  %v586_v4 = vsel %vm399_vm0, %v333_v61, 0.0  ;;  %v222_v61 = vld [vmem:[%s4899_s1 + $0x278] sm:$0xff]  ;;  %v640_v24 = vsel %vm399_vm0, %v351_v15, 0.0  ;;  %v235_v15 = vld [vmem:[%s4899_s1 + $0x2e0] sm:$0xff] }
  0x66   :  { %548 = vadd.xlane.f32.xlu1 %v547_v10  ;;  %v595_v10 = vsel %vm399_vm0, %v336_v3, 0.0 }
  0x67   :  { %545 = vadd.xlane.f32.xlu0 %v544_v12  ;;  %v592_v12 = vsel %vm399_vm0, %v335_v5, 0.0  ;;  %v349_v5 = vmul.f32 %v221_v63, %v93_v62  ;;  %v106_v62 = vld [vmem:[%s4898_s0 + $0x2d8] sm:$0xff] }
  0x68   :  { %v234_v63 = vld [vmem:[%s4899_s1 + $0x2d8] sm:$0xff] }
  0x69   :  { %v634_v14 = vsel %vm399_vm0, %v349_v5, 0.0 }
  0x6a   :  { %554 = vadd.xlane.f32.xlu1 %v553_v18  ;;  %v601_v18 = vsel %vm399_vm0, %v338_v11, 0.0 }
  0x6b   :  { %551 = vadd.xlane.f32.xlu0 %v550_v20  ;;  %v598_v20 = vsel %vm399_vm0, %v337_v13, 0.0 }
  0x6e   :  { %560 = vadd.xlane.f32.xlu1 %v559_v26  ;;  %v607_v26 = vsel %vm399_vm0, %v340_v19, 0.0  ;;  %v225_v19 = vld [vmem:[%s4899_s1 + $0x290] sm:$0xff] }
  0x6f   :  { %557 = vadd.xlane.f32.xlu0 %v556_v28  ;;  %v604_v28 = vsel %vm399_vm0, %v339_v21, 0.0 }
  0x72   :  { %566 = vadd.xlane.f32.xlu1 %v565_v34 }
  0x73   :  { %563 = vadd.xlane.f32.xlu0 %v562_v36  ;;  %v344_v36 = vmul.f32 %v216_v31, %v88_v30  ;;  %v649_v31 = vsel %vm399_vm0, %v354_v22, 0.0 }
  0x75   :  { %v619_v45 = vsel %vm399_vm0, %v344_v36, 0.0 }
  0x76   :  { %572 = vadd.xlane.f32.xlu1 %v571_v42  ;;  %v89_v42 = vld [vmem:[%s4898_s0 + $0x250] sm:$0xff] }
  0x77   :  { %569 = vadd.xlane.f32.xlu0 %v568_v44  ;;  %v345_v49 = vmul.f32 %v217_v43, %v89_v42 }
  0x7a   :  { %578 = vadd.xlane.f32.xlu1 %v577_v50  ;;  %v92_v50 = vld [vmem:[%s4898_s0 + $0x268] sm:$0xff] }
  0x7b   :  { %575 = vadd.xlane.f32.xlu0 %v574_v52  ;;  %v91_v52 = vld [vmem:[%s4898_s0 + $0x260] sm:$0xff]  ;;  %v348_v56 = vmul.f32 %v220_v51, %v92_v50  ;;  %v104_v50 = vld [vmem:[%s4898_s0 + $0x2c8] sm:$0xff] }
  0x7c   :  { %v347_v59 = vmul.f32 %v219_v53, %v91_v52  ;;  %v232_v51 = vld [vmem:[%s4899_s1 + $0x2c8] sm:$0xff]  ;;  %v103_v52 = vld [vmem:[%s4898_s0 + $0x2c0] sm:$0xff] }
  0x7d   :  { %v631_v1 = vsel %vm399_vm0, %v348_v56, 0.0  ;;  %v231_v53 = vld [vmem:[%s4899_s1 + $0x2c0] sm:$0xff] }
  0x7e   :  { %584 = vadd.xlane.f32.xlu1 %v583_v58  ;;  %v622_v58 = vsel %vm399_vm0, %v345_v49, 0.0  ;;  %v357_v49 = vmul.f32 %v229_v41, %v101_v40  ;;  %v111_v40 = vld [vmem:[%s4898_s0 + $0x300] sm:$0xff] }
  0x7f   :  { %581 = vadd.xlane.f32.xlu0 %v580_v60  ;;  %v94_v60 = vld [vmem:[%s4898_s0 + $0x278] sm:$0xff]  ;;  %v239_v41 = vld [vmem:[%s4899_s1 + $0x300] sm:$0xff] }
  0x82   :  { %590 = vadd.xlane.f32.xlu1 %v589_v2  ;;  %v350_v2 = vmul.f32 %v222_v61, %v94_v60  ;;  %v658_v60 = vsel %vm399_vm0, %v357_v49, 0.0  ;;  %v359_v61 = vmul.f32 %v231_v53, %v103_v52  ;;  %v114_v52 = vld [vmem:[%s4898_s0 + $0x318] sm:$0xff] }
  0x83   :  { %587 = vadd.xlane.f32.xlu0 %v586_v4  ;;  %v628_v4 = vsel %vm399_vm0, %v347_v59, 0.0  ;;  %v242_v53 = vld [vmem:[%s4899_s1 + $0x318] sm:$0xff] }
  0x84   :  { %v637_v11 = vsel %vm399_vm0, %v350_v2, 0.0  ;;  %v233_v2 = vld [vmem:[%s4899_s1 + $0x2d0] sm:$0xff]  ;;  %v664_v8 = vsel %vm399_vm0, %v359_v61, 0.0 }
  0x86   :  { %596 = vadd.xlane.f32.xlu1 %v595_v10 }
  0x87   :  { %593 = vadd.xlane.f32.xlu0 %v592_v12  ;;  %v352_v12 = vmul.f32 %v224_v7, %v96_v6  ;;  %v362_v6 = vmul.f32 %v234_v63, %v106_v62  ;;  %v370_v62 = vmul.f32 %v242_v53, %v114_v52 }
  0x89   :  { %v643_v21 = vsel %vm399_vm0, %v352_v12, 0.0  ;;  %v236_v12 = vld [vmem:[%s4899_s1 + $0x2e8] sm:$0xff]  ;;  %v673_v17 = vsel %vm399_vm0, %v362_v6, 0.0 }
  0x8a   :  { %602 = vadd.xlane.f32.xlu1 %v601_v18  ;;  %v97_v18 = vld [vmem:[%s4898_s0 + $0x290] sm:$0xff]  ;;  %v244_v6 = vld [vmem:[%s4899_s1 + $0x328] sm:$0xff] }
  0x8b   :  { %599 = vadd.xlane.f32.xlu0 %v598_v20  ;;  %v353_v25 = vmul.f32 %v225_v19, %v97_v18 }
  0x8e   :  { %608 = vadd.xlane.f32.xlu1 %v607_v26  ;;  %v100_v26 = vld [vmem:[%s4898_s0 + $0x2a8] sm:$0xff] }
  0x8f   :  { %605 = vadd.xlane.f32.xlu0 %v604_v28  ;;  %v3346_v34 = vpop.xlane.xlu1 %407  ;;  %v3349_v37 = vpop.xlane.xlu0 %401  ;;  %v99_v28 = vld [vmem:[%s4898_s0 + $0x2a0] sm:$0xff]  ;;  %v356_v32 = vmul.f32 %v228_v27, %v100_v26  ;;  %v109_v26 = vld [vmem:[%s4898_s0 + $0x2f0] sm:$0xff] }
  0x90   :  { %v355_v36 = vmul.f32 %v227_v29, %v99_v28  ;;  %v237_v27 = vld [vmem:[%s4899_s1 + $0x2f0] sm:$0xff] }
  0x91   :  { %v655_v43 = vsel %vm399_vm0, %v356_v32, 0.0 }
  0x92   :  { %614 = vadd.xlane.f32.xlu1 %v613_v35  ;;  %v646_v35 = vsel %vm399_vm0, %v353_v25, 0.0  ;;  %v238_v25 = vld [vmem:[%s4899_s1 + $0x2f8] sm:$0xff] }
  0x93   :  { %611 = vadd.xlane.f32.xlu0 %v610_v38  ;;  %v3364_v44 = vpop.xlane.xlu1 %410  ;;  %v3367_v47 = vpop.xlane.xlu0 %404  ;;  %v102_v38 = vld [vmem:[%s4898_s0 + $0x2b8] sm:$0xff] }
  0x96   :  { %620 = vadd.xlane.f32.xlu1 %v619_v45  ;;  %v358_v45 = vmul.f32 %v230_v39, %v102_v38  ;;  %v112_v38 = vld [vmem:[%s4898_s0 + $0x308] sm:$0xff] }
  0x97   :  { %617 = vadd.xlane.f32.xlu0 %v616_v48  ;;  %v3382_v54 = vpop.xlane.xlu1 %416  ;;  %v3385_v57 = vpop.xlane.xlu0 %413  ;;  %v652_v48 = vsel %vm399_vm0, %v355_v36, 0.0  ;;  %v365_v36 = vmul.f32 %v237_v27, %v109_v26  ;;  %v240_v39 = vld [vmem:[%s4899_s1 + $0x308] sm:$0xff] }
  0x98   :  { %v661_v56 = vsel %vm399_vm0, %v358_v45, 0.0 }
  0x9a   :  { %626 = vadd.xlane.f32.xlu1 %v625_v55 }
  0x9b   :  { %623 = vadd.xlane.f32.xlu0 %v622_v58  ;;  %v3400_v0 = vpop.xlane.xlu1 %422  ;;  %v3403_v3 = vpop.xlane.xlu0 %419  ;;  %v360_v58 = vmul.f32 %v232_v51, %v104_v50  ;;  %v682_v50 = vsel %vm399_vm0, %v365_v36, 0.0  ;;  %v367_v51 = vmul.f32 %v239_v41, %v111_v40  ;;  %v119_v40 = vld [vmem:[%s4898_s0 + $0x340] sm:$0xff] }
  0x9c   :  { %v247_v41 = vld [vmem:[%s4899_s1 + $0x340] sm:$0xff] }
  0x9d   :  { %v667_v5 = vsel %vm399_vm0, %v360_v58, 0.0  ;;  %v241_v58 = vld [vmem:[%s4899_s1 + $0x310] sm:$0xff]  ;;  %v375_v53 = vmul.f32 %v247_v41, %v119_v40 }
  0x9e   :  { %632 = vadd.xlane.f32.xlu1 %v631_v1  ;;  %v105_v1 = vld [vmem:[%s4898_s0 + $0x2d0] sm:$0xff] }
  0x9f   :  { %629 = vadd.xlane.f32.xlu0 %v628_v4  ;;  %v3418_v10 = vpop.xlane.xlu1 %428  ;;  %v3421_v13 = vpop.xlane.xlu0 %425  ;;  %v361_v9 = vmul.f32 %v233_v2, %v105_v1  ;;  %v688_v1 = vsel %vm399_vm0, %v367_v51, 0.0 }
  0xa2   :  { %638 = vadd.xlane.f32.xlu1 %v637_v11  ;;  %v108_v11 = vld [vmem:[%s4898_s0 + $0x2e8] sm:$0xff] }
  0xa3   :  { %635 = vadd.xlane.f32.xlu0 %v634_v14  ;;  %v3436_v20 = vpop.xlane.xlu1 %434  ;;  %v3439_v23 = vpop.xlane.xlu0 %431  ;;  %v107_v14 = vld [vmem:[%s4898_s0 + $0x2e0] sm:$0xff]  ;;  %v364_v18 = vmul.f32 %v236_v12, %v108_v11  ;;  %v697_v12 = vsel %vm399_vm0, %v370_v62, 0.0  ;;  %v249_v62 = vld [vmem:[%s4899_s1 + $0x350] sm:$0xff] }
  0xa4   :  { %v363_v22 = vmul.f32 %v235_v15, %v107_v14 }
  0xa5   :  { %v679_v29 = vsel %vm399_vm0, %v364_v18, 0.0 }
  0xa6   :  { %644 = vadd.xlane.f32.xlu1 %v643_v21  ;;  %v670_v21 = vsel %vm399_vm0, %v361_v9, 0.0  ;;  %v243_v9 = vld [vmem:[%s4899_s1 + $0x320] sm:$0xff] }
  0xa7   :  { %641 = vadd.xlane.f32.xlu0 %v640_v24  ;;  %v3454_v30 = vpop.xlane.xlu1 %440  ;;  %v3457_v33 = vpop.xlane.xlu0 %437  ;;  %v110_v24 = vld [vmem:[%s4898_s0 + $0x2f8] sm:$0xff] }
  0xaa   :  { %650 = vadd.xlane.f32.xlu1 %v649_v31  ;;  %v366_v31 = vmul.f32 %v238_v25, %v110_v24  ;;  %v117_v24 = vld [vmem:[%s4898_s0 + $0x330] sm:$0xff] }
  0xab   :  { %647 = vadd.xlane.f32.xlu0 %v646_v35  ;;  %v3472_v42 = vpop.xlane.xlu1 %446  ;;  %v3475_v46 = vpop.xlane.xlu0 %443  ;;  %v676_v35 = vsel %vm399_vm0, %v363_v22, 0.0  ;;  %v246_v22 = vld [vmem:[%s4899_s1 + $0x338] sm:$0xff]  ;;  %v245_v25 = vld [vmem:[%s4899_s1 + $0x330] sm:$0xff] }
  0xac   :  { %v685_v45 = vsel %vm399_vm0, %v366_v31, 0.0  ;;  %v373_v36 = vmul.f32 %v245_v25, %v117_v24 }
  0xae   :  { %656 = vadd.xlane.f32.xlu1 %v655_v43  ;;  %v706_v52 = vsel %vm399_vm0, %v373_v36, 0.0  ;;  %v254_v36 = vld [vmem:[%s4899_s1 + $0x378] sm:$0xff] }
  0xaf   :  { %653 = vadd.xlane.f32.xlu0 %v652_v48  ;;  %v3490_v55 = vpop.xlane.xlu1 %452  ;;  %v3493_v59 = vpop.xlane.xlu0 %449  ;;  %v368_v48 = vmul.f32 %v240_v39, %v112_v38  ;;  %v120_v38 = vld [vmem:[%s4898_s0 + $0x348] sm:$0xff] }
  0xb0   :  { %v248_v39 = vld [vmem:[%s4899_s1 + $0x348] sm:$0xff] }
  0xb1   :  { %v691_v61 = vsel %vm399_vm0, %v368_v48, 0.0 }
  0xb2   :  { %662 = vadd.xlane.f32.xlu1 %v661_v56  ;;  %v113_v56 = vld [vmem:[%s4898_s0 + $0x310] sm:$0xff] }
  0xb3   :  { %659 = vadd.xlane.f32.xlu0 %v658_v60  ;;  %v3508_v4 = vpop.xlane.xlu1 %458  ;;  %v3511_v7 = vpop.xlane.xlu0 %455  ;;  %v369_v2 = vmul.f32 %v241_v58, %v113_v56  ;;  %v122_v56 = vld [vmem:[%s4898_s0 + $0x358] sm:$0xff] }
  0xb4   :  { %v250_v58 = vld [vmem:[%s4899_s1 + $0x358] sm:$0xff] }
  0xb6   :  { %668 = vadd.xlane.f32.xlu1 %v667_v5  ;;  %v116_v5 = vld [vmem:[%s4898_s0 + $0x328] sm:$0xff] }
  0xb7   :  { %665 = vadd.xlane.f32.xlu0 %v664_v8  ;;  %v3526_v16 = vpop.xlane.xlu1 %464  ;;  %v3529_v19 = vpop.xlane.xlu0 %461  ;;  %v115_v8 = vld [vmem:[%s4898_s0 + $0x320] sm:$0xff]  ;;  %v372_v14 = vmul.f32 %v244_v6, %v116_v5  ;;  %v378_v5 = vmul.f32 %v250_v58, %v122_v56  ;;  %v128_v56 = vld [vmem:[%s4898_s0 + $0x388] sm:$0xff] }
  0xb8   :  { %v371_v18 = vmul.f32 %v243_v9, %v115_v8  ;;  %v712_v8 = vsel %vm399_vm0, %v375_v53, 0.0  ;;  %v256_v58 = vld [vmem:[%s4899_s1 + $0x388] sm:$0xff] }
  0xb9   :  { %v703_v27 = vsel %vm399_vm0, %v372_v14, 0.0  ;;  %v252_v14 = vld [vmem:[%s4899_s1 + $0x368] sm:$0xff] }
  0xba   :  { %674 = vadd.xlane.f32.xlu1 %v673_v17  ;;  %v694_v17 = vsel %vm399_vm0, %v369_v2, 0.0 }
  0xbb   :  { %671 = vadd.xlane.f32.xlu0 %v670_v21  ;;  %v3544_v28 = vpop.xlane.xlu1 %470  ;;  %v3547_v32 = vpop.xlane.xlu0 %467  ;;  %v118_v21 = vld [vmem:[%s4898_s0 + $0x338] sm:$0xff] }
  0xbe   :  { %680 = vadd.xlane.f32.xlu1 %v679_v29  ;;  %v374_v29 = vmul.f32 %v246_v22, %v118_v21  ;;  %v721_v22 = vsel %vm399_vm0, %v378_v5, 0.0 }
  0xbf   :  { %677 = vadd.xlane.f32.xlu0 %v676_v35  ;;  %v3562_v43 = vpop.xlane.xlu1 %476  ;;  %v3565_v49 = vpop.xlane.xlu0 %473  ;;  %v700_v35 = vsel %vm399_vm0, %v371_v18, 0.0  ;;  %v251_v18 = vld [vmem:[%s4899_s1 + $0x360] sm:$0xff] }
  0xc0   :  { %v709_v48 = vsel %vm399_vm0, %v374_v29, 0.0 }
  0xc2   :  { %686 = vadd.xlane.f32.xlu1 %v685_v45 }
  0xc3   :  { %683 = vadd.xlane.f32.xlu0 %v682_v50  ;;  %v3580_v60 = vpop.xlane.xlu1 %482  ;;  %v3583_v63 = vpop.xlane.xlu0 %479  ;;  %v376_v50 = vmul.f32 %v248_v39, %v120_v38  ;;  %v125_v38 = vld [vmem:[%s4898_s0 + $0x370] sm:$0xff] }
  0xc4   :  { %4906 = vst [vmem:[#allocation5_spill] sm:$0xff] %v3580_v60  ;;  %4907 = vst [vmem:[#allocation6_spill] sm:$0xff] %v3583_v63  ;;  %v253_v39 = vld [vmem:[%s4899_s1 + $0x370] sm:$0xff] }
  0xc5   :  { %v715_v2 = vsel %vm399_vm0, %v376_v50, 0.0  ;;  %v381_v53 = vmul.f32 %v253_v39, %v125_v38 }
  0xc6   :  { %692 = vadd.xlane.f32.xlu1 %v691_v61  ;;  %v121_v61 = vld [vmem:[%s4898_s0 + $0x350] sm:$0xff] }
  0xc7   :  { %689 = vadd.xlane.f32.xlu0 %v688_v1  ;;  %v3598_v11 = vpop.xlane.xlu1 %488  ;;  %v3601_v15 = vpop.xlane.xlu0 %485  ;;  %v377_v9 = vmul.f32 %v249_v62, %v121_v61  ;;  %v127_v61 = vld [vmem:[%s4898_s0 + $0x380] sm:$0xff] }
  0xc8   :  { %4908 = vst [vmem:[#allocation7_spill] sm:$0xff] %v3598_v11  ;;  %4909 = vst [vmem:[#allocation8_spill] sm:$0xff] %v3601_v15  ;;  %v255_v62 = vld [vmem:[%s4899_s1 + $0x380] sm:$0xff] }
  0xca   :  { %698 = vadd.xlane.f32.xlu1 %v697_v12  ;;  %v124_v12 = vld [vmem:[%s4898_s0 + $0x368] sm:$0xff] }
  0xcb   :  { %695 = vadd.xlane.f32.xlu0 %v694_v17  ;;  %v3616_v26 = vpop.xlane.xlu1 %494  ;;  %v123_v17 = vld [vmem:[%s4898_s0 + $0x360] sm:$0xff]  ;;  %v380_v24 = vmul.f32 %v252_v14, %v124_v12  ;;  %v730_v12 = vsel %vm399_vm0, %v381_v53, 0.0  ;;  %v383_v14 = vmul.f32 %v255_v62, %v127_v61 }
  0xcc   :  { %4910 = vst [vmem:[#allocation9_spill] sm:$0xff] %v3616_v26  ;;  %v3619_v31 = vpop.xlane.xlu0 %491  ;;  %v379_v29 = vmul.f32 %v251_v18, %v123_v17  ;;  %v130_v17 = vld [vmem:[%s4898_s0 + $0x398] sm:$0xff]  ;;  %v259_v53 = vld [vmem:[%s4899_s1 + $0x3a0] sm:$0xff] }
  0xcd   :  { %4911 = vst [vmem:[#allocation10_spill] sm:$0xff] %v3619_v31  ;;  %v727_v41 = vsel %vm399_vm0, %v380_v24, 0.0  ;;  %v258_v18 = vld [vmem:[%s4899_s1 + $0x398] sm:$0xff]  ;;  %v257_v24 = vld [vmem:[%s4899_s1 + $0x390] sm:$0xff]  ;;  %v736_v38 = vsel %vm399_vm0, %v383_v14, 0.0 }
  0xce   :  { %704 = vadd.xlane.f32.xlu1 %v703_v27  ;;  %v718_v27 = vsel %vm399_vm0, %v377_v9, 0.0  ;;  %v262_v14 = vld [vmem:[%s4899_s1 + $0x3b8] sm:$0xff] }
  0xcf   :  { %701 = vadd.xlane.f32.xlu0 %v700_v35  ;;  %v3634_v45 = vpop.xlane.xlu1 %500  ;;  %v126_v35 = vld [vmem:[%s4898_s0 + $0x378] sm:$0xff] }
  0xd0   :  { %4912 = vst [vmem:[#allocation11_spill] sm:$0xff] %v3634_v45  ;;  %v3637_v51 = vpop.xlane.xlu0 %497 }
  0xd1   :  { %4913 = vst [vmem:[#allocation12_spill] sm:$0xff] %v3637_v51 }
  0xd2   :  { %710 = vadd.xlane.f32.xlu1 %v709_v48  ;;  %v382_v48 = vmul.f32 %v254_v36, %v126_v35  ;;  %v386_v35 = vmul.f32 %v258_v18, %v130_v17  ;;  %v133_v17 = vld [vmem:[%s4898_s0 + $0x3b0] sm:$0xff] }
  0xd3   :  { %707 = vadd.xlane.f32.xlu0 %v706_v52  ;;  %v3652_v1 = vpop.xlane.xlu1 %506  ;;  %v724_v52 = vsel %vm399_vm0, %v379_v29, 0.0  ;;  %v261_v18 = vld [vmem:[%s4899_s1 + $0x3b0] sm:$0xff] }
  0xd4   :  { %4914 = vst [vmem:[#allocation13_spill] sm:$0xff] %v3652_v1  ;;  %v3655_v6 = vpop.xlane.xlu0 %503  ;;  %v733_v5 = vsel %vm399_vm0, %v382_v48, 0.0  ;;  %v260_v48 = vld [vmem:[%s4899_s1 + $0x3a8] sm:$0xff] }
  0xd5   :  { %4915 = vst [vmem:[#allocation14_spill] sm:$0xff] %v3655_v6 }
  0xd6   :  { %716 = vadd.xlane.f32.xlu1 %v715_v2 }
  0xd7   :  { %713 = vadd.xlane.f32.xlu0 %v712_v8  ;;  %v3670_v21 = vpop.xlane.xlu1 %512  ;;  %v384_v8 = vmul.f32 %v256_v58, %v128_v56  ;;  %v745_v58 = vsel %vm399_vm0, %v386_v35, 0.0 }
  0xd8   :  { %4916 = vst [vmem:[#allocation15_spill] sm:$0xff] %v3670_v21  ;;  %v3673_v25 = vpop.xlane.xlu0 %509 }
  0xd9   :  { %4917 = vst [vmem:[#allocation16_spill] sm:$0xff] %v3673_v25  ;;  %v739_v29 = vsel %vm399_vm0, %v384_v8, 0.0 }
  0xda   :  { %722 = vadd.xlane.f32.xlu1 %v721_v22  ;;  %v129_v22 = vld [vmem:[%s4898_s0 + $0x390] sm:$0xff] }
  0xdb   :  { %719 = vadd.xlane.f32.xlu0 %v718_v27  ;;  %v3688_v40 = vpop.xlane.xlu1 %518  ;;  %v385_v39 = vmul.f32 %v257_v24, %v129_v22 }
  0xdc   :  { %4918 = vst [vmem:[#allocation17_spill] sm:$0xff] %v3688_v40  ;;  %v3691_v50 = vpop.xlane.xlu0 %515 }
  0xdd   :  { %4919 = vst [vmem:[#allocation18_spill] sm:$0xff] %v3691_v50 }
  0xde   :  { %728 = vadd.xlane.f32.xlu1 %v727_v41  ;;  %v132_v41 = vld [vmem:[%s4898_s0 + $0x3a8] sm:$0xff] }
  0xdf   :  { %725 = vadd.xlane.f32.xlu0 %v724_v52  ;;  %v3706_v2 = vpop.xlane.xlu1 %524  ;;  %v131_v52 = vld [vmem:[%s4898_s0 + $0x3a0] sm:$0xff]  ;;  %v388_v61 = vmul.f32 %v260_v48, %v132_v41  ;;  %v136_v41 = vld [vmem:[%s4898_s0 + $0x3c8] sm:$0xff] }
  0xe0   :  { %4920 = vst [vmem:[#allocation19_spill] sm:$0xff] %v3706_v2  ;;  %v3709_v9 = vpop.xlane.xlu0 %521  ;;  %v387_v8 = vmul.f32 %v259_v53, %v131_v52  ;;  %v264_v48 = vld [vmem:[%s4899_s1 + $0x3c8] sm:$0xff]  ;;  %v135_v52 = vld [vmem:[%s4898_s0 + $0x3c0] sm:$0xff] }
  0xe1   :  { %4921 = vst [vmem:[#allocation20_spill] sm:$0xff] %v3709_v9  ;;  %v751_v24 = vsel %vm399_vm0, %v388_v61, 0.0  ;;  %v263_v53 = vld [vmem:[%s4899_s1 + $0x3c0] sm:$0xff] }
  0xe2   :  { %734 = vadd.xlane.f32.xlu1 %v733_v5  ;;  %v742_v5 = vsel %vm399_vm0, %v385_v39, 0.0  ;;  %v389_v39 = vmul.f32 %v261_v18, %v133_v17  ;;  %v138_v17 = vld [vmem:[%s4898_s0 + $0x3d8] sm:$0xff] }
  0xe3   :  { %731 = vadd.xlane.f32.xlu0 %v730_v12  ;;  %v3724_v27 = vpop.xlane.xlu1 %530  ;;  %v134_v12 = vld [vmem:[%s4898_s0 + $0x3b8] sm:$0xff] }
  0xe4   :  { %4922 = vst [vmem:[#allocation21_spill] sm:$0xff] %v3724_v27  ;;  %v3727_v36 = vpop.xlane.xlu0 %527  ;;  %v266_v18 = vld [vmem:[%s4899_s1 + $0x3d8] sm:$0xff] }
  0xe5   :  { %4923 = vst [vmem:[#allocation22_spill] sm:$0xff] %v3727_v36 }
  0xe6   :  { %740 = vadd.xlane.f32.xlu1 %v739_v29  ;;  %v390_v29 = vmul.f32 %v262_v14, %v134_v12  ;;  %v754_v12 = vsel %vm399_vm0, %v389_v39, 0.0  ;;  %v391_v14 = vmul.f32 %v263_v53, %v135_v52 }
  0xe7   :  { %737 = vadd.xlane.f32.xlu0 %v736_v38  ;;  %v3742_v56 = vpop.xlane.xlu1 %536  ;;  %v748_v38 = vsel %vm399_vm0, %v387_v8, 0.0 }
  0xe8   :  { %4924 = vst [vmem:[#allocation23_spill] sm:$0xff] %v3742_v56  ;;  %v3745_v62 = vpop.xlane.xlu0 %533  ;;  %v757_v61 = vsel %vm399_vm0, %v390_v29, 0.0  ;;  %v265_v29 = vld [vmem:[%s4899_s1 + $0x3d0] sm:$0xff]  ;;  %v760_v52 = vsel %vm399_vm0, %v391_v14, 0.0 }
  0xe9   :  { %4925 = vst [vmem:[#allocation24_spill] sm:$0xff] %v3745_v62 }
  0xea   :  { %746 = vadd.xlane.f32.xlu1 %v745_v58 }
  0xeb   :  { %743 = vadd.xlane.f32.xlu0 %v742_v5  ;;  %v3760_v22 = vpop.xlane.xlu1 %542  ;;  %v392_v5 = vmul.f32 %v264_v48, %v136_v41  ;;  %v394_v41 = vmul.f32 %v266_v18, %v138_v17 }
  0xec   :  { %4926 = vst [vmem:[#allocation25_spill] sm:$0xff] %v3760_v22  ;;  %v3763_v35 = vpop.xlane.xlu0 %539 }
  0xed   :  { %4927 = vst [vmem:[#allocation26_spill] sm:$0xff] %v3763_v35  ;;  %v763_v39 = vsel %vm399_vm0, %v392_v5, 0.0  ;;  %v267_v5 = vld [vmem:[%s4899_s1 + $0x3e0] sm:$0xff]  ;;  %v769_v14 = vsel %vm399_vm0, %v394_v41, 0.0 }
  0xee   :  { %752 = vadd.xlane.f32.xlu1 %v751_v24  ;;  %v137_v24 = vld [vmem:[%s4898_s0 + $0x3d0] sm:$0xff] }
  0xef   :  { %749 = vadd.xlane.f32.xlu0 %v748_v38  ;;  %v3778_v58 = vpop.xlane.xlu1 %548  ;;  %v393_v53 = vmul.f32 %v265_v29, %v137_v24 }
  0xf0   :  { %4928 = vst [vmem:[#allocation27_spill] sm:$0xff] %v3778_v58  ;;  %v3781_v8 = vpop.xlane.xlu0 %545  ;;  %v268_v58 = vld [vmem:[%s4899_s1 + $0x3e8] sm:$0xff] }
  0xf1   :  { %4929 = vst [vmem:[#allocation28_spill] sm:$0xff] %v3781_v8  ;;  %v140_v8 = vld [vmem:[%s4898_s0 + $0x3e8] sm:$0xff]  ;;  %v766_v24 = vsel %vm399_vm0, %v393_v53, 0.0 }
  0xf2   :  { %758 = vadd.xlane.f32.xlu1 %v757_v61  ;;  %v139_v61 = vld [vmem:[%s4898_s0 + $0x3e0] sm:$0xff]  ;;  %v396_v17 = vmul.f32 %v268_v58, %v140_v8  ;;  %v269_v58 = vld [vmem:[%s4899_s1 + $0x3f0] sm:$0xff] }
  0xf3   :  { %755 = vadd.xlane.f32.xlu0 %v754_v12  ;;  %v3796_v38 = vpop.xlane.xlu1 %554  ;;  %v395_v29 = vmul.f32 %v267_v5, %v139_v61 }
  0xf4   :  { %4930 = vst [vmem:[#allocation29_spill] sm:$0xff] %v3796_v38  ;;  %v3799_v48 = vpop.xlane.xlu0 %551  ;;  %v270_v38 = vld [vmem:[%s4899_s1 + $0x3f8] sm:$0xff]  ;;  %v775_v41 = vsel %vm399_vm0, %v396_v17, 0.0 }
  0xf5   :  { %4931 = vst [vmem:[#allocation30_spill] sm:$0xff] %v3799_v48  ;;  %v142_v48 = vld [vmem:[%s4898_s0 + $0x3f8] sm:$0xff]  ;;  %v772_v61 = vsel %vm399_vm0, %v395_v29, 0.0 }
  0xf6   :  { %764 = vadd.xlane.f32.xlu1 %v763_v39  ;;  %v141_v39 = vld [vmem:[%s4898_s0 + $0x3f0] sm:$0xff] }
  0xf7   :  { %761 = vadd.xlane.f32.xlu0 %v760_v52  ;;  %v3814_v12 = vpop.xlane.xlu1 %560  ;;  %v398_v52 = vmul.f32 %v270_v38, %v142_v48  ;;  %v397_v5 = vmul.f32 %v269_v58, %v141_v39  ;;  %v4902_v38 = vlaneseq }
  0xf8   :  { %4932 = vst [vmem:[#allocation31_spill] sm:$0xff] %v3814_v12  ;;  %v3817_v18 = vpop.xlane.xlu0 %557 }
  0xf9   :  { %4933 = vst [vmem:[#allocation32_spill] sm:$0xff] %v3817_v18  ;;  %v781_v12 = vsel %vm399_vm0, %v398_v52, 0.0  ;;  %v3851_v29 = vshrl.u32 %v4902_v38, 7 }
  0xfa   :  { %770 = vadd.xlane.f32.xlu1 %v769_v14  ;;  %v778_v14 = vsel %vm399_vm0, %v397_v5, 0.0  ;;  %vm2754_vm0 = vcmask 1041409  }
  0xfb   :  { %767 = vadd.xlane.f32.xlu0 %v766_v24  ;;  %v3832_v8 = vpop.xlane.xlu1 %566  ;;  %4941 = vst [vmem:[#allocation40_spill] sm:$0xff] %v3851_v29  ;;  %v1123_v56 = vsub.s32 5, %v3851_v29  ;;  %v1190_v11 = vsub.s32 6, %v3851_v29 }
  0xfc   :  { %4934 = vst [vmem:[#allocation33_spill] sm:$0xff] %v3832_v8  ;;  %v3835_v53 = vpop.xlane.xlu0 %563 }
  0xfd   :  { %4935 = vst [vmem:[#allocation34_spill] sm:$0xff] %v3835_v53 }
  0xfe   :  { %776 = vadd.xlane.f32.xlu1 %v775_v41  ;;  %v788_v41 = vsub.s32 0, %v3851_v29 }
  0xff   :  { %773 = vadd.xlane.f32.xlu0 %v772_v61  ;;  %v3838_v18 = vpop.xlane.xlu1 %572 }
 0x100   :  { %4936 = vst [vmem:[#allocation35_spill] sm:$0xff] %v3838_v18  ;;  %v3841_v35 = vpop.xlane.xlu0 %569 }
 0x101   :  { %4937 = vst [vmem:[#allocation36_spill] sm:$0xff] %v3841_v35 }
 0x102   :  { %782 = vadd.xlane.f32.xlu1 %v781_v12  ;;  %v3863_v12 = vld [vmem:[%s4900_s2] sm:$0xff]  ;;  %s2811_s2 = smov [#allocation2]  }
 0x103   :  { %779 = vadd.xlane.f32.xlu0 %v778_v14  ;;  %v3844_v24 = vpop.xlane.xlu1 %578  ;;  %v789_v5 = vrot.slane %v3863_v12, %v788_v41  ;;  %v1124_v9 = vrot.slane %v3863_v12, %v1123_v56  ;;  %s2776_s11 = sshll.u32 %s2811_s2, 4  ;;  %s2777_s11 = int_to_ptr.vmem [resolvable:$true] %s2776_s11 }
 0x104   :  { %4938 = vst [vmem:[#allocation37_spill] sm:$0xff] %v3844_v24  ;;  %v3846_v48 = vpop.xlane.xlu0 %575  ;;  %s2788_s12 = scalar_lea.vmem %s2777_s11, 128  ;;  %p2793_p1 = scmp.lt.s32.totalorder %s2777_s11, %s2777_s11 }
 0x105   :  { %4939 = vst [vmem:[#allocation38_spill] sm:$0xff] %v3846_v48  ;;  %p2789_p0 = scmp.ne.s32.totalorder %s2777_s11, %s2788_s12  ;;  %p2794_p2 = scmp.lt.s32.totalorder %s2788_s12, %s2788_s12 }
 0x107   :  { %v3848_v17 = vpop.xlane.xlu1 %584  ;;  %p2795_p3 = por %p2794_p2, %p2793_p1 }
 0x108   :  { %4940 = vst [vmem:[#allocation39_spill] sm:$0xff] %v3848_v17  ;;  %v3853_v39 = vpop.xlane.xlu0 %581 }
 0x109   :  { %4942 = vst [vmem:[#allocation41_spill] sm:$0xff] %v3853_v39  ;;  %p2796_p4 = pnand %p2795_p3, %p2789_p0 }
 0x10b   :  { %v3855_v58 = vpop.xlane.xlu1 %590 }
 0x10c   :  { %4943 = vst [vmem:[#allocation42_spill] sm:$0xff] %v3855_v58  ;;  %v3858_v52 = vpop.xlane.xlu0 %587 }
 0x10d   :  { %4944 = vst [vmem:[#allocation43_spill] sm:$0xff] %v3858_v52 }
 0x10f   :  { %v3865_v61 = vpop.xlane.xlu1 %596 }
 0x110   :  { %4945 = vst [vmem:[#allocation44_spill] sm:$0xff] %v3865_v61  ;;  %v3868_v14 = vpop.xlane.xlu0 %593 }
 0x111   :  { %4946 = vst [vmem:[#allocation45_spill] sm:$0xff] %v3868_v14 }
 0x113   :  { %795 = vbcast.lane.b32.xlu1 %v789_v5, 264  ;;  %v3870_v38 = vpop.xlane.xlu1 %602 }
 0x114   :  { %4947 = vst [vmem:[#allocation46_spill] sm:$0xff] %v3870_v38  ;;  %v3872_v39 = vpop.xlane.xlu0 %599 }
 0x115   :  { %4948 = vst [vmem:[#allocation47_spill] sm:$0xff] %v3872_v39 }
 0x117   :  { %799 = vbcast.lane.b32.xlu1 %v789_v5, 272  ;;  %v3874_v58 = vpop.xlane.xlu1 %608 }
 0x118   :  { %4949 = vst [vmem:[#allocation48_spill] sm:$0xff] %v3874_v58  ;;  %v3876_v52 = vpop.xlane.xlu0 %605 }
 0x119   :  { %4950 = vst [vmem:[#allocation49_spill] sm:$0xff] %v3876_v52  ;;  %791 = vbcast.lane.b32.xlu0 %v789_v5, 256 }
 0x11b   :  { %803 = vbcast.lane.b32.xlu1 %v789_v5, 280  ;;  %v3878_v17 = vpop.xlane.xlu1 %614 }
 0x11c   :  { %4951 = vst [vmem:[#allocation50_spill] sm:$0xff] %v3878_v17  ;;  %v3880_v48 = vpop.xlane.xlu0 %611 }
 0x11d   :  { %4952 = vst [vmem:[#allocation51_spill] sm:$0xff] %v3880_v48  ;;  %807 = vbcast.lane.b32.xlu0 %v789_v5, 288 }
 0x11f   :  { %811 = vbcast.lane.b32.xlu1 %v789_v5, 296  ;;  %v3882_v41 = vpop.xlane.xlu1 %620 }
 0x120   :  { %4953 = vst [vmem:[#allocation52_spill] sm:$0xff] %v3882_v41  ;;  %v3884_v14 = vpop.xlane.xlu0 %617 }
 0x121   :  { %4954 = vst [vmem:[#allocation53_spill] sm:$0xff] %v3884_v14  ;;  %815 = vbcast.lane.b32.xlu0 %v789_v5, 304  ;;  %v855_v14 = vsub.s32 1, %v3851_v29 }
 0x123   :  { %819 = vbcast.lane.b32.xlu1 %v789_v5, 312  ;;  %v3886_v39 = vpop.xlane.xlu1 %626 }
 0x124   :  { %4955 = vst [vmem:[#allocation54_spill] sm:$0xff] %v3886_v39  ;;  %v3888_v38 = vpop.xlane.xlu0 %623 }
 0x125   :  { %4956 = vst [vmem:[#allocation55_spill] sm:$0xff] %v3888_v38  ;;  %823 = vbcast.lane.b32.xlu0 %v789_v5, 320  ;;  %v856_v38 = vrot.slane %v3863_v12, %v855_v14 }
 0x127   :  { %827 = vbcast.lane.b32.xlu1 %v789_v5, 328  ;;  %v3890_v52 = vpop.xlane.xlu1 %632 }
 0x128   :  { %4957 = vst [vmem:[#allocation56_spill] sm:$0xff] %v3890_v52  ;;  %v3892_v58 = vpop.xlane.xlu0 %629 }
 0x129   :  { %4958 = vst [vmem:[#allocation57_spill] sm:$0xff] %v3892_v58  ;;  %831 = vbcast.lane.b32.xlu0 %v789_v5, 336 }
 0x12b   :  { %835 = vbcast.lane.b32.xlu1 %v789_v5, 344  ;;  %v3894_v48 = vpop.xlane.xlu1 %638 }
 0x12c   :  { %4959 = vst [vmem:[#allocation58_spill] sm:$0xff] %v3894_v48  ;;  %v3896_v17 = vpop.xlane.xlu0 %635 }
 0x12d   :  { %4960 = vst [vmem:[#allocation59_spill] sm:$0xff] %v3896_v17  ;;  %839 = vbcast.lane.b32.xlu0 %v789_v5, 352 }
 0x12f   :  { %843 = vbcast.lane.b32.xlu1 %v789_v5, 360  ;;  %v3899_v41 = vpop.xlane.xlu1 %644 }
 0x130   :  { %4961 = vst [vmem:[#allocation60_spill] sm:$0xff] %v3899_v41  ;;  %v3901_v39 = vpop.xlane.xlu0 %641 }
 0x131   :  { %4962 = vst [vmem:[#allocation61_spill] sm:$0xff] %v3901_v39  ;;  %847 = vbcast.lane.b32.xlu0 %v789_v5, 368 }
 0x133   :  { %851 = vbcast.lane.b32.xlu1 %v789_v5, 376  ;;  %v3904_v52 = vpop.xlane.xlu1 %650 }
 0x134   :  { %4963 = vst [vmem:[#allocation62_spill] sm:$0xff] %v3904_v52  ;;  %v3906_v58 = vpop.xlane.xlu0 %647 }
 0x135   :  { %4964 = vst [vmem:[#allocation63_spill] sm:$0xff] %v3906_v58  ;;  %858 = vbcast.lane.b32.xlu0 %v856_v38, 256 }
 0x137   :  { %862 = vbcast.lane.b32.xlu1 %v856_v38, 264  ;;  %v3908_v48 = vpop.xlane.xlu1 %656 }
 0x138   :  { %4965 = vst [vmem:[#allocation64_spill] sm:$0xff] %v3908_v48  ;;  %v3910_v17 = vpop.xlane.xlu0 %653 }
 0x139   :  { %4966 = vst [vmem:[#allocation65_spill] sm:$0xff] %v3910_v17  ;;  %866 = vbcast.lane.b32.xlu0 %v856_v38, 272 }
 0x13b   :  { %870 = vbcast.lane.b32.xlu1 %v856_v38, 280  ;;  %v3912_v61 = vpop.xlane.xlu1 %662 }
 0x13c   :  { %4967 = vst [vmem:[#allocation66_spill] sm:$0xff] %v3912_v61  ;;  %v3914_v41 = vpop.xlane.xlu0 %659 }
 0x13d   :  { %4968 = vst [vmem:[#allocation67_spill] sm:$0xff] %v3914_v41  ;;  %874 = vbcast.lane.b32.xlu0 %v856_v38, 288 }
 0x13f   :  { %878 = vbcast.lane.b32.xlu1 %v856_v38, 296  ;;  %v3916_v14 = vpop.xlane.xlu1 %668 }
 0x140   :  { %4969 = vst [vmem:[#allocation68_spill] sm:$0xff] %v3916_v14  ;;  %v3918_v5 = vpop.xlane.xlu0 %665 }
 0x141   :  { %4970 = vst [vmem:[#allocation69_spill] sm:$0xff] %v3918_v5  ;;  %882 = vbcast.lane.b32.xlu0 %v856_v38, 304  ;;  %v922_v5 = vsub.s32 2, %v3851_v29 }
 0x143   :  { %886 = vbcast.lane.b32.xlu1 %v856_v38, 312  ;;  %v3920_v58 = vpop.xlane.xlu1 %674 }
 0x144   :  { %4971 = vst [vmem:[#allocation70_spill] sm:$0xff] %v3920_v58  ;;  %v3922_v52 = vpop.xlane.xlu0 %671 }
 0x145   :  { %4972 = vst [vmem:[#allocation71_spill] sm:$0xff] %v3922_v52  ;;  %890 = vbcast.lane.b32.xlu0 %v856_v38, 320  ;;  %v923_v52 = vrot.slane %v3863_v12, %v922_v5 }
 0x147   :  { %894 = vbcast.lane.b32.xlu1 %v856_v38, 328  ;;  %v3924_v17 = vpop.xlane.xlu1 %680 }
 0x148   :  { %4973 = vst [vmem:[#allocation72_spill] sm:$0xff] %v3924_v17  ;;  %v3926_v48 = vpop.xlane.xlu0 %677 }
 0x149   :  { %4974 = vst [vmem:[#allocation73_spill] sm:$0xff] %v3926_v48  ;;  %898 = vbcast.lane.b32.xlu0 %v856_v38, 336 }
 0x14b   :  { %902 = vbcast.lane.b32.xlu1 %v856_v38, 344  ;;  %v3928_v41 = vpop.xlane.xlu1 %686 }
 0x14c   :  { %4975 = vst [vmem:[#allocation74_spill] sm:$0xff] %v3928_v41  ;;  %v3930_v61 = vpop.xlane.xlu0 %683 }
 0x14d   :  { %4976 = vst [vmem:[#allocation75_spill] sm:$0xff] %v3930_v61  ;;  %906 = vbcast.lane.b32.xlu0 %v856_v38, 352 }
 0x14f   :  { %910 = vbcast.lane.b32.xlu1 %v856_v38, 360  ;;  %v3933_v14 = vpop.xlane.xlu1 %692 }
 0x150   :  { %4977 = vst [vmem:[#allocation76_spill] sm:$0xff] %v3933_v14  ;;  %v3935_v58 = vpop.xlane.xlu0 %689 }
 0x151   :  { %4978 = vst [vmem:[#allocation77_spill] sm:$0xff] %v3935_v58  ;;  %914 = vbcast.lane.b32.xlu0 %v856_v38, 368 }
 0x153   :  { %918 = vbcast.lane.b32.xlu1 %v856_v38, 376  ;;  %v3938_v17 = vpop.xlane.xlu1 %698 }
 0x154   :  { %4979 = vst [vmem:[#allocation78_spill] sm:$0xff] %v3938_v17  ;;  %v3940_v48 = vpop.xlane.xlu0 %695 }
 0x155   :  { %4980 = vst [vmem:[#allocation79_spill] sm:$0xff] %v3940_v48  ;;  %925 = vbcast.lane.b32.xlu0 %v923_v52, 256 }
 0x157   :  { %929 = vbcast.lane.b32.xlu1 %v923_v52, 264  ;;  %v3942_v41 = vpop.xlane.xlu1 %704 }
 0x158   :  { %4981 = vst [vmem:[#allocation80_spill] sm:$0xff] %v3942_v41  ;;  %v3944_v61 = vpop.xlane.xlu0 %701 }
 0x159   :  { %4982 = vst [vmem:[#allocation81_spill] sm:$0xff] %v3944_v61  ;;  %933 = vbcast.lane.b32.xlu0 %v923_v52, 272 }
 0x15b   :  { %937 = vbcast.lane.b32.xlu1 %v923_v52, 280  ;;  %v3946_v39 = vpop.xlane.xlu1 %710 }
 0x15c   :  { %4983 = vst [vmem:[#allocation82_spill] sm:$0xff] %v3946_v39  ;;  %v3948_v14 = vpop.xlane.xlu0 %707 }
 0x15d   :  { %4984 = vst [vmem:[#allocation83_spill] sm:$0xff] %v3948_v14  ;;  %941 = vbcast.lane.b32.xlu0 %v923_v52, 288 }
 0x15f   :  { %945 = vbcast.lane.b32.xlu1 %v923_v52, 296  ;;  %v3950_v5 = vpop.xlane.xlu1 %716 }
 0x160   :  { %4985 = vst [vmem:[#allocation84_spill] sm:$0xff] %v3950_v5  ;;  %v3952_v38 = vpop.xlane.xlu0 %713 }
 0x161   :  { %4986 = vst [vmem:[#allocation85_spill] sm:$0xff] %v3952_v38  ;;  %949 = vbcast.lane.b32.xlu0 %v923_v52, 304  ;;  %v989_v38 = vsub.s32 3, %v3851_v29 }
 0x163   :  { %953 = vbcast.lane.b32.xlu1 %v923_v52, 312  ;;  %v3954_v48 = vpop.xlane.xlu1 %722 }
 0x164   :  { %4987 = vst [vmem:[#allocation86_spill] sm:$0xff] %v3954_v48  ;;  %v3956_v17 = vpop.xlane.xlu0 %719 }
 0x165   :  { %4988 = vst [vmem:[#allocation87_spill] sm:$0xff] %v3956_v17  ;;  %957 = vbcast.lane.b32.xlu0 %v923_v52, 320  ;;  %v990_v17 = vrot.slane %v3863_v12, %v989_v38 }
 0x167   :  { %961 = vbcast.lane.b32.xlu1 %v923_v52, 328  ;;  %v3958_v61 = vpop.xlane.xlu1 %728 }
 0x168   :  { %4989 = vst [vmem:[#allocation88_spill] sm:$0xff] %v3958_v61  ;;  %v3960_v41 = vpop.xlane.xlu0 %725 }
 0x169   :  { %4990 = vst [vmem:[#allocation89_spill] sm:$0xff] %v3960_v41  ;;  %965 = vbcast.lane.b32.xlu0 %v923_v52, 336 }
 0x16b   :  { %969 = vbcast.lane.b32.xlu1 %v923_v52, 344  ;;  %v3962_v14 = vpop.xlane.xlu1 %734 }
 0x16c   :  { %4991 = vst [vmem:[#allocation90_spill] sm:$0xff] %v3962_v14  ;;  %v3964_v39 = vpop.xlane.xlu0 %731 }
 0x16d   :  { %4992 = vst [vmem:[#allocation91_spill] sm:$0xff] %v3964_v39  ;;  %973 = vbcast.lane.b32.xlu0 %v923_v52, 352 }
 0x16f   :  { %977 = vbcast.lane.b32.xlu1 %v923_v52, 360  ;;  %v3967_v5 = vpop.xlane.xlu1 %740 }
 0x170   :  { %4993 = vst [vmem:[#allocation92_spill] sm:$0xff] %v3967_v5  ;;  %v3969_v48 = vpop.xlane.xlu0 %737 }
 0x171   :  { %4994 = vst [vmem:[#allocation93_spill] sm:$0xff] %v3969_v48  ;;  %981 = vbcast.lane.b32.xlu0 %v923_v52, 368 }
 0x173   :  { %985 = vbcast.lane.b32.xlu1 %v923_v52, 376  ;;  %v3972_v61 = vpop.xlane.xlu1 %746 }
 0x174   :  { %4995 = vst [vmem:[#allocation94_spill] sm:$0xff] %v3972_v61  ;;  %v3974_v41 = vpop.xlane.xlu0 %743 }
 0x175   :  { %4996 = vst [vmem:[#allocation95_spill] sm:$0xff] %v3974_v41  ;;  %992 = vbcast.lane.b32.xlu0 %v990_v17, 256 }
 0x177   :  { %996 = vbcast.lane.b32.xlu1 %v990_v17, 264  ;;  %v3976_v14 = vpop.xlane.xlu1 %752 }
 0x178   :  { %4997 = vst [vmem:[#allocation96_spill] sm:$0xff] %v3976_v14  ;;  %v3978_v39 = vpop.xlane.xlu0 %749 }
 0x179   :  { %4998 = vst [vmem:[#allocation97_spill] sm:$0xff] %v3978_v39  ;;  %1000 = vbcast.lane.b32.xlu0 %v990_v17, 272 }
 0x17b   :  { %1004 = vbcast.lane.b32.xlu1 %v990_v17, 280  ;;  %v3980_v58 = vpop.xlane.xlu1 %758 }
 0x17c   :  { %4999 = vst [vmem:[#allocation98_spill] sm:$0xff] %v3980_v58  ;;  %v3982_v5 = vpop.xlane.xlu0 %755 }
 0x17d   :  { %5000 = vst [vmem:[#allocation99_spill] sm:$0xff] %v3982_v5  ;;  %1008 = vbcast.lane.b32.xlu0 %v990_v17, 288 }
 0x17f   :  { %1012 = vbcast.lane.b32.xlu1 %v990_v17, 296  ;;  %v3984_v38 = vpop.xlane.xlu1 %764 }
 0x180   :  { %5001 = vst [vmem:[#allocation100_spill] sm:$0xff] %v3984_v38  ;;  %v3986_v52 = vpop.xlane.xlu0 %761 }
 0x181   :  { %5002 = vst [vmem:[#allocation101_spill] sm:$0xff] %v3986_v52  ;;  %1016 = vbcast.lane.b32.xlu0 %v990_v17, 304  ;;  %v1056_v52 = vsub.s32 4, %v3851_v29 }
 0x183   :  { %1020 = vbcast.lane.b32.xlu1 %v990_v17, 312  ;;  %v3988_v41 = vpop.xlane.xlu1 %770 }
 0x184   :  { %5003 = vst [vmem:[#allocation102_spill] sm:$0xff] %v3988_v41  ;;  %v3990_v61 = vpop.xlane.xlu0 %767 }
 0x185   :  { %5004 = vst [vmem:[#allocation103_spill] sm:$0xff] %v3990_v61  ;;  %1024 = vbcast.lane.b32.xlu0 %v990_v17, 320  ;;  %v1057_v61 = vrot.slane %v3863_v12, %v1056_v52 }
 0x187   :  { %1028 = vbcast.lane.b32.xlu1 %v990_v17, 328  ;;  %v3992_v39 = vpop.xlane.xlu1 %776 }
 0x188   :  { %5005 = vst [vmem:[#allocation104_spill] sm:$0xff] %v3992_v39  ;;  %v3994_v14 = vpop.xlane.xlu0 %773  ;;  %v2810_v39 = vmov 0  }
 0x189   :  { %5006 = vst [vmem:[#allocation105_spill] sm:$0xff] %v3994_v14  ;;  %1032 = vbcast.lane.b32.xlu0 %v990_v17, 336  ;;  %2787 = vset.pattern.permute.xlu1 %v2810_v39 }
 0x18a   :  { %2786 = vset.pattern.permute.xlu0 %v2810_v39 }
 0x18b   :  { %1036 = vbcast.lane.b32.xlu1 %v990_v17, 344  ;;  %v3996_v5 = vpop.xlane.xlu1 %782 }
 0x18c   :  { %5007 = vst [vmem:[#allocation106_spill] sm:$0xff] %v3996_v5  ;;  %v3998_v58 = vpop.xlane.xlu0 %779 }
 0x18d   :  { %5008 = vst [vmem:[#allocation107_spill] sm:$0xff] %v3998_v58  ;;  %1040 = vbcast.lane.b32.xlu0 %v990_v17, 352 }
 0x18f   :  { %1044 = vbcast.lane.b32.xlu1 %v990_v17, 360  ;;  %v4001_v38 = vpop.permute.xlu1 %795 }
 0x190   :  { %v4003_v41 = vpop.permute.xlu0 %791 }
 0x191   :  { %1048 = vbcast.lane.b32.xlu0 %v990_v17, 368 }
 0x193   :  { %1052 = vbcast.lane.b32.xlu1 %v990_v17, 376  ;;  %v4006_v14 = vpop.permute.xlu1 %799 }
 0x194   :  { %v4008_v5 = vpop.permute.xlu0 %807 }
 0x195   :  { %1059 = vbcast.lane.b32.xlu0 %v1057_v61, 256 }
 0x197   :  { %1063 = vbcast.lane.b32.xlu1 %v1057_v61, 264  ;;  %v4010_v58 = vpop.permute.xlu1 %803 }
 0x198   :  { %v4012_v48 = vpop.permute.xlu0 %815 }
 0x199   :  { %1067 = vbcast.lane.b32.xlu0 %v1057_v61, 272 }
 0x19b   :  { %1071 = vbcast.lane.b32.xlu1 %v1057_v61, 280  ;;  %v4014_v24 = vpop.permute.xlu1 %811 }
 0x19c   :  { %v4016_v35 = vpop.permute.xlu0 %823 }
 0x19d   :  { %1075 = vbcast.lane.b32.xlu0 %v1057_v61, 288 }
 0x19f   :  { %1079 = vbcast.lane.b32.xlu1 %v1057_v61, 296  ;;  %v4018_v39 = vpop.permute.xlu1 %819 }
 0x1a0   :  { %v4020_v17 = vpop.permute.xlu0 %831 }
 0x1a1   :  { %1083 = vbcast.lane.b32.xlu0 %v1057_v61, 304 }
 0x1a3   :  { %1087 = vbcast.lane.b32.xlu1 %v1057_v61, 312  ;;  %v4022_v52 = vpop.permute.xlu1 %827 }
 0x1a4   :  { %v4024_v18 = vpop.permute.xlu0 %839 }
 0x1a5   :  { %1091 = vbcast.lane.b32.xlu0 %v1057_v61, 320 }
 0x1a7   :  { %1095 = vbcast.lane.b32.xlu1 %v1057_v61, 328  ;;  %v4026_v53 = vpop.permute.xlu1 %835 }
 0x1a8   :  { %v4028_v8 = vpop.permute.xlu0 %847 }
 0x1a9   :  { %1099 = vbcast.lane.b32.xlu0 %v1057_v61, 336 }
 0x1ab   :  { %1103 = vbcast.lane.b32.xlu1 %v1057_v61, 344  ;;  %v4030_v22 = vpop.permute.xlu1 %843 }
 0x1ac   :  { %v4032_v62 = vpop.permute.xlu0 %858 }
 0x1ad   :  { %1107 = vbcast.lane.b32.xlu0 %v1057_v61, 352 }
 0x1af   :  { %1111 = vbcast.lane.b32.xlu1 %v1057_v61, 360  ;;  %v4035_v36 = vpop.permute.xlu1 %851 }
 0x1b0   :  { %v4037_v27 = vpop.permute.xlu0 %866 }
 0x1b1   :  { %1115 = vbcast.lane.b32.xlu0 %v1057_v61, 368 }
 0x1b3   :  { %1119 = vbcast.lane.b32.xlu1 %v1057_v61, 376  ;;  %v4040_v2 = vpop.permute.xlu1 %862 }
 0x1b4   :  { %v4042_v50 = vpop.permute.xlu0 %874 }
 0x1b5   :  { %1126 = vbcast.lane.b32.xlu0 %v1124_v9, 256 }
 0x1b7   :  { %1130 = vbcast.lane.b32.xlu1 %v1124_v9, 264  ;;  %v4044_v40 = vpop.permute.xlu1 %870 }
 0x1b8   :  { %v4046_v25 = vpop.permute.xlu0 %882 }
 0x1b9   :  { %1134 = vbcast.lane.b32.xlu0 %v1124_v9, 272 }
 0x1bb   :  { %1138 = vbcast.lane.b32.xlu1 %v1124_v9, 280  ;;  %v4048_v21 = vpop.permute.xlu1 %878 }
 0x1bc   :  { %v4050_v6 = vpop.permute.xlu0 %890 }
 0x1bd   :  { %1142 = vbcast.lane.b32.xlu0 %v1124_v9, 288 }
 0x1bf   :  { %1146 = vbcast.lane.b32.xlu1 %v1124_v9, 296  ;;  %v4052_v56 = vpop.permute.xlu1 %886 }
 0x1c0   :  { %v4054_v61 = vpop.permute.xlu0 %898 }
 0x1c1   :  { %5009 = vst [vmem:[#allocation108_spill] sm:$0xff] %v4054_v61  ;;  %1150 = vbcast.lane.b32.xlu0 %v1124_v9, 304 }
 0x1c3   :  { %1154 = vbcast.lane.b32.xlu1 %v1124_v9, 312  ;;  %v4056_v1 = vpop.permute.xlu1 %894 }
 0x1c4   :  { %v4058_v51 = vpop.permute.xlu0 %906 }
 0x1c5   :  { %5010 = vst [vmem:[#allocation109_spill] sm:$0xff] %v4058_v51  ;;  %1158 = vbcast.lane.b32.xlu0 %v1124_v9, 320  ;;  %v1191_v51 = vrot.slane %v3863_v12, %v1190_v11 }
 0x1c7   :  { %1162 = vbcast.lane.b32.xlu1 %v1124_v9, 328  ;;  %v4060_v45 = vpop.permute.xlu1 %902 }
 0x1c8   :  { %5011 = vst [vmem:[#allocation110_spill] sm:$0xff] %v4060_v45  ;;  %v4062_v31 = vpop.permute.xlu0 %914 }
 0x1c9   :  { %5012 = vst [vmem:[#allocation111_spill] sm:$0xff] %v4062_v31  ;;  %1166 = vbcast.lane.b32.xlu0 %v1124_v9, 336 }
 0x1cb   :  { %1170 = vbcast.lane.b32.xlu1 %v1124_v9, 344  ;;  %v4064_v26 = vpop.permute.xlu1 %910 }
 0x1cc   :  { %5013 = vst [vmem:[#allocation112_spill] sm:$0xff] %v4064_v26  ;;  %v4066_v15 = vpop.permute.xlu0 %925 }
 0x1cd   :  { %5014 = vst [vmem:[#allocation113_spill] sm:$0xff] %v4066_v15  ;;  %1174 = vbcast.lane.b32.xlu0 %v1124_v9, 352 }
 0x1cf   :  { %1178 = vbcast.lane.b32.xlu1 %v1124_v9, 360  ;;  %v4069_v61 = vpop.permute.xlu1 %918 }
 0x1d0   :  { %5015 = vst [vmem:[#allocation114_spill] sm:$0xff] %v4069_v61  ;;  %v4071_v63 = vpop.permute.xlu0 %933 }
 0x1d1   :  { %5016 = vst [vmem:[#allocation115_spill] sm:$0xff] %v4071_v63  ;;  %1182 = vbcast.lane.b32.xlu0 %v1124_v9, 368 }
 0x1d3   :  { %1186 = vbcast.lane.b32.xlu1 %v1124_v9, 376  ;;  %v4074_v45 = vpop.permute.xlu1 %929 }
 0x1d4   :  { %v4076_v31 = vpop.permute.xlu0 %941 }
 0x1d5   :  { %5017 = vst [vmem:[#allocation116_spill] sm:$0xff] %v4076_v31  ;;  %1193 = vbcast.lane.b32.xlu0 %v1191_v51, 256 }
 0x1d7   :  { %1197 = vbcast.lane.b32.xlu1 %v1191_v51, 264  ;;  %v4078_v26 = vpop.permute.xlu1 %937 }
 0x1d8   :  { %5018 = vst [vmem:[#allocation117_spill] sm:$0xff] %v4078_v26  ;;  %v4080_v15 = vpop.permute.xlu0 %949 }
 0x1d9   :  { %5019 = vst [vmem:[#allocation118_spill] sm:$0xff] %v4080_v15  ;;  %1201 = vbcast.lane.b32.xlu0 %v1191_v51, 272 }
 0x1db   :  { %1205 = vbcast.lane.b32.xlu1 %v1191_v51, 280  ;;  %v4082_v60 = vpop.permute.xlu1 %945 }
 0x1dc   :  { %5020 = vst [vmem:[#allocation119_spill] sm:$0xff] %v4082_v60  ;;  %v4084_v61 = vpop.permute.xlu0 %957 }
 0x1dd   :  { %5021 = vst [vmem:[#allocation120_spill] sm:$0xff] %v4084_v61  ;;  %1209 = vbcast.lane.b32.xlu0 %v1191_v51, 288 }
 0x1df   :  { %1213 = vbcast.lane.b32.xlu1 %v1191_v51, 296  ;;  %v4086_v11 = vpop.permute.xlu1 %953 }
 0x1e0   :  { %5022 = vst [vmem:[#allocation121_spill] sm:$0xff] %v4086_v11  ;;  %v4088_v9 = vpop.permute.xlu0 %965 }
 0x1e1   :  { %5023 = vst [vmem:[#allocation122_spill] sm:$0xff] %v4088_v9  ;;  %1217 = vbcast.lane.b32.xlu0 %v1191_v51, 304  ;;  %v1257_v9 = vsub.s32 7, %v3851_v29 }
 0x1e3   :  { %1221 = vbcast.lane.b32.xlu1 %v1191_v51, 312  ;;  %v4090_v31 = vpop.permute.xlu1 %961 }
 0x1e4   :  { %5024 = vst [vmem:[#allocation123_spill] sm:$0xff] %v4090_v31  ;;  %v4092_v63 = vpop.permute.xlu0 %973 }
 0x1e5   :  { %5025 = vst [vmem:[#allocation124_spill] sm:$0xff] %v4092_v63  ;;  %1225 = vbcast.lane.b32.xlu0 %v1191_v51, 320  ;;  %v1258_v63 = vrot.slane %v3863_v12, %v1257_v9 }
 0x1e7   :  { %1229 = vbcast.lane.b32.xlu1 %v1191_v51, 328  ;;  %v4094_v15 = vpop.permute.xlu1 %969 }
 0x1e8   :  { %5026 = vst [vmem:[#allocation125_spill] sm:$0xff] %v4094_v15  ;;  %v4096_v26 = vpop.permute.xlu0 %981 }
 0x1e9   :  { %5027 = vst [vmem:[#allocation126_spill] sm:$0xff] %v4096_v26  ;;  %1233 = vbcast.lane.b32.xlu0 %v1191_v51, 336 }
 0x1eb   :  { %1237 = vbcast.lane.b32.xlu1 %v1191_v51, 344  ;;  %v4098_v61 = vpop.permute.xlu1 %977 }
 0x1ec   :  { %5028 = vst [vmem:[#allocation127_spill] sm:$0xff] %v4098_v61  ;;  %v4100_v60 = vpop.permute.xlu0 %992 }
 0x1ed   :  { %5029 = vst [vmem:[#allocation128_spill] sm:$0xff] %v4100_v60  ;;  %1241 = vbcast.lane.b32.xlu0 %v1191_v51, 352 }
 0x1ef   :  { %1245 = vbcast.lane.b32.xlu1 %v1191_v51, 360  ;;  %v4103_v11 = vpop.permute.xlu1 %985 }
 0x1f0   :  { %5030 = vst [vmem:[#allocation129_spill] sm:$0xff] %v4103_v11  ;;  %v4105_v31 = vpop.permute.xlu0 %1000 }
 0x1f1   :  { %5031 = vst [vmem:[#allocation130_spill] sm:$0xff] %v4105_v31  ;;  %1249 = vbcast.lane.b32.xlu0 %v1191_v51, 368 }
 0x1f3   :  { %1253 = vbcast.lane.b32.xlu1 %v1191_v51, 376  ;;  %v4108_v15 = vpop.permute.xlu1 %996 }
 0x1f4   :  { %v4110_v26 = vpop.permute.xlu0 %1008 }
 0x1f5   :  { %5032 = vst [vmem:[#allocation131_spill] sm:$0xff] %v4110_v26  ;;  %1260 = vbcast.lane.b32.xlu0 %v1258_v63, 256 }
 0x1f7   :  { %1264 = vbcast.lane.b32.xlu1 %v1258_v63, 264  ;;  %v4112_v61 = vpop.permute.xlu1 %1004 }
 0x1f8   :  { %v4114_v60 = vpop.permute.xlu0 %1016 }
 0x1f9   :  { %5033 = vst [vmem:[#allocation132_spill] sm:$0xff] %v4114_v60  ;;  %1268 = vbcast.lane.b32.xlu0 %v1258_v63, 272 }
 0x1fb   :  { %1272 = vbcast.lane.b32.xlu1 %v1258_v63, 280  ;;  %v4116_v29 = vpop.permute.xlu1 %1012 }
 0x1fc   :  { %5034 = vst [vmem:[#allocation133_spill] sm:$0xff] %v4116_v29  ;;  %v4118_v11 = vpop.permute.xlu0 %1024 }
 0x1fd   :  { %5035 = vst [vmem:[#allocation134_spill] sm:$0xff] %v4118_v11  ;;  %1276 = vbcast.lane.b32.xlu0 %v1258_v63, 288 }
 0x1ff   :  { %1280 = vbcast.lane.b32.xlu1 %v1258_v63, 296  ;;  %v4120_v12 = vpop.permute.xlu1 %1020 }
 0x200   :  { %5036 = vst [vmem:[#allocation135_spill] sm:$0xff] %v4120_v12  ;;  %v4122_v51 = vpop.permute.xlu0 %1032 }
 0x201   :  { %5037 = vst [vmem:[#allocation136_spill] sm:$0xff] %v4122_v51  ;;  %1284 = vbcast.lane.b32.xlu0 %v1258_v63, 304 }
 0x203   :  { %1288 = vbcast.lane.b32.xlu1 %v1258_v63, 312  ;;  %v4124_v9 = vpop.permute.xlu1 %1028 }
 0x204   :  { %5038 = vst [vmem:[#allocation137_spill] sm:$0xff] %v4124_v9  ;;  %v4126_v26 = vpop.permute.xlu0 %1040 }
 0x205   :  { %5039 = vst [vmem:[#allocation138_spill] sm:$0xff] %v4126_v26  ;;  %1292 = vbcast.lane.b32.xlu0 %v1258_v63, 320  ;;  %v1450_v26 = vadd.f32 %v4003_v41, %v3349_v37  ;;  %v1452_v37 = vadd.f32 %v4006_v14, %v3346_v34  ;;  %v1461_v14 = vadd.f32 %v4026_v53, %v3436_v20 }
 0x206   :  { %v1462_v20 = vadd.f32 %v4024_v18, %v3457_v33 }
 0x207   :  { %1296 = vbcast.lane.b32.xlu1 %v1258_v63, 328  ;;  %v4128_v60 = vpop.permute.xlu1 %1036 }
 0x208   :  { %5040 = vst [vmem:[#allocation139_spill] sm:$0xff] %v4128_v60  ;;  %v4130_v31 = vpop.permute.xlu0 %1048 }
 0x209   :  { %5041 = vst [vmem:[#allocation140_spill] sm:$0xff] %v4130_v31  ;;  %1300 = vbcast.lane.b32.xlu0 %v1258_v63, 336 }
 0x20b   :  { %1304 = vbcast.lane.b32.xlu1 %v1258_v63, 344  ;;  %v4132_v11 = vpop.permute.xlu1 %1044 }
 0x20c   :  { %5042 = vst [vmem:[#allocation141_spill] sm:$0xff] %v4132_v11  ;;  %v4134_v29 = vpop.permute.xlu0 %1059  ;;  %v1451_v11 = vadd.f32 %v4001_v38, %v3367_v47 }
 0x20d   :  { %5043 = vst [vmem:[#allocation142_spill] sm:$0xff] %v4134_v29  ;;  %1308 = vbcast.lane.b32.xlu0 %v1258_v63, 352  ;;  %v1453_v29 = vadd.f32 %v4010_v58, %v3364_v44  ;;  %v1454_v44 = vadd.f32 %v4008_v5, %v3385_v57 }
 0x20f   :  { %1312 = vbcast.lane.b32.xlu1 %v1258_v63, 360  ;;  %v4136_v51 = vpop.permute.xlu1 %1052 }
 0x210   :  { %v4138_v12 = vpop.permute.xlu0 %1067 }
 0x211   :  { %5044 = vst [vmem:[#allocation143_spill] sm:$0xff] %v4138_v12  ;;  %1316 = vbcast.lane.b32.xlu0 %v1258_v63, 368 }
 0x213   :  { %1320 = vbcast.lane.b32.xlu1 %v1258_v63, 376  ;;  %v4142_v60 = vpop.permute.xlu1 %1063  ;;  %v1455_v63 = vadd.f32 %v4014_v24, %v3382_v54  ;;  %v1456_v54 = vadd.f32 %v4012_v48, %v3403_v3  ;;  %v1459_v24 = vadd.f32 %v4022_v52, %v3418_v10  ;;  %v1460_v10 = vadd.f32 %v4020_v17, %v3439_v23  ;;  %v5046_v17 = vld [vmem:[#allocation110_spill] sm:$0xff] }
 0x214   :  { %v4144_v31 = vpop.permute.xlu0 %1075  ;;  %v1463_v48 = vadd.f32 %v4030_v22, %v3454_v30  ;;  %v1464_v30 = vadd.f32 %v4028_v8, %v3475_v46  ;;  %v1467_v22 = vadd.f32 %v4040_v2, %v3490_v55  ;;  %v1468_v55 = vadd.f32 %v4037_v27, %v3511_v7 }
 0x215   :  { %1707 = vperm.xlu0 %2786, %v1450_v26   ;;  %v1457_v26 = vadd.f32 %v4018_v39, %v3400_v0  ;;  %v1458_v0 = vadd.f32 %v4016_v35, %v3421_v13  ;;  %v1465_v35 = vadd.f32 %v4035_v36, %v3472_v42  ;;  %v1466_v42 = vadd.f32 %v4032_v62, %v3493_v59 }
 0x216   :  { %v1469_v36 = vadd.f32 %v4044_v40, %v3508_v4  ;;  %v1471_v2 = vadd.f32 %v4048_v21, %v3526_v16  ;;  %v1470_v4 = vadd.f32 %v4042_v50, %v3529_v19  ;;  %v1473_v40 = vadd.f32 %v4052_v56, %v3544_v28  ;;  %v5045_v50 = vld [vmem:[#allocation5_spill] sm:$0xff] }
 0x217   :  { %v4150_v9 = vpop.permute.xlu1 %1071  ;;  %1710 = vperm.xlu1 %2787, %v1451_v11   ;;  %v1472_v16 = vadd.f32 %v4046_v25, %v3547_v32  ;;  %v1475_v21 = vadd.f32 %v4056_v1, %v3562_v43  ;;  %v1474_v28 = vadd.f32 %v4050_v6, %v3565_v49  ;;  %v1477_v52 = vadd.f32 %v5046_v17, %v5045_v50  ;;  %v5047_v25 = vld [vmem:[#allocation6_spill] sm:$0xff]  ;;  %v5048_v11 = vld [vmem:[#allocation108_spill] sm:$0xff]  ;;  %v5049_v1 = vld [vmem:[#allocation7_spill] sm:$0xff] }
 0x218   :  { %v4152_v12 = vpop.permute.xlu0 %1083  ;;  %v1476_v43 = vadd.f32 %v5048_v11, %v5047_v25  ;;  %v5051_v6 = vld [vmem:[#allocation8_spill] sm:$0xff]  ;;  %v5063_v25 = vld [vmem:[#allocation115_spill] sm:$0xff] }
 0x219   :  { %1716 = vperm.xlu0 %2786, %v1453_v29   ;;  %v5064_v11 = vld [vmem:[#allocation15_spill] sm:$0xff] }
 0x21b   :  { %v4158_v41 = vpop.permute.xlu1 %1079  ;;  %1713 = vperm.xlu1 %2787, %v1452_v37   ;;  %v5050_v37 = vld [vmem:[#allocation112_spill] sm:$0xff] }
 0x21c   :  { %v4160_v47 = vpop.permute.xlu0 %1091 }
 0x21d   :  { %1722 = vperm.xlu0 %2786, %v1455_v63   ;;  %v1479_v63 = vadd.f32 %v5050_v37, %v5049_v1 }
 0x21f   :  { %v4166_v58 = vpop.permute.xlu1 %1087  ;;  %1719 = vperm.xlu1 %2787, %v1454_v44  }
 0x220   :  { %v4168_v34 = vpop.permute.xlu0 %1099 }
 0x221   :  { %1728 = vperm.xlu0 %2786, %v1457_v26   ;;  %v5052_v26 = vld [vmem:[#allocation109_spill] sm:$0xff] }
 0x223   :  { %v4174_v29 = vpop.permute.xlu1 %1095  ;;  %1725 = vperm.xlu1 %2787, %v1456_v54   ;;  %v1478_v54 = vadd.f32 %v5052_v26, %v5051_v6  ;;  %v5066_v6 = vld [vmem:[#allocation16_spill] sm:$0xff] }
 0x224   :  { %v4176_v57 = vpop.permute.xlu0 %1107  ;;  %v5067_v26 = vld [vmem:[#allocation116_spill] sm:$0xff] }
 0x225   :  { %1734 = vperm.xlu0 %2786, %v1459_v24   ;;  %v5053_v24 = vld [vmem:[#allocation9_spill] sm:$0xff] }
 0x227   :  { %v4182_v5 = vpop.permute.xlu1 %1103  ;;  %1731 = vperm.xlu1 %2787, %v1458_v0   ;;  %v5054_v0 = vld [vmem:[#allocation114_spill] sm:$0xff] }
 0x228   :  { %v4184_v3 = vpop.permute.xlu0 %1115 }
 0x229   :  { %1740 = vperm.xlu0 %2786, %v1461_v14   ;;  %v1481_v14 = vadd.f32 %v5054_v0, %v5053_v24  ;;  %v5068_v24 = vld [vmem:[#allocation17_spill] sm:$0xff] }
 0x22a   :  { %v5069_v0 = vld [vmem:[#allocation121_spill] sm:$0xff] }
 0x22b   :  { %v4190_v38 = vpop.permute.xlu1 %1111  ;;  %1737 = vperm.xlu1 %2787, %v1460_v10  }
 0x22c   :  { %v4192_v13 = vpop.permute.xlu0 %1126 }
 0x22d   :  { %1746 = vperm.xlu0 %2786, %v1463_v48  }
 0x22f   :  { %v4198_v53 = vpop.permute.xlu1 %1119  ;;  %1743 = vperm.xlu1 %2787, %v1462_v20   ;;  %v5055_v20 = vld [vmem:[#allocation10_spill] sm:$0xff] }
 0x230   :  { %v4200_v23 = vpop.permute.xlu0 %1134 }
 0x231   :  { %1752 = vperm.xlu0 %2786, %v1465_v35   ;;  %v5056_v35 = vld [vmem:[#allocation111_spill] sm:$0xff] }
 0x233   :  { %v4206_v39 = vpop.permute.xlu1 %1130  ;;  %1749 = vperm.xlu1 %2787, %v1464_v30   ;;  %v1480_v30 = vadd.f32 %v5056_v35, %v5055_v20 }
 0x234   :  { %v4208_v33 = vpop.permute.xlu0 %1142 }
 0x235   :  { %1758 = vperm.xlu0 %2786, %v1467_v22   ;;  %v5057_v22 = vld [vmem:[#allocation11_spill] sm:$0xff] }
 0x237   :  { %v4214_v18 = vpop.permute.xlu1 %1138  ;;  %1755 = vperm.xlu1 %2787, %v1466_v42   ;;  %v1483_v42 = vadd.f32 %v4074_v45, %v5057_v22  ;;  %v5071_v22 = vld [vmem:[#allocation118_spill] sm:$0xff] }
 0x238   :  { %v4216_v46 = vpop.permute.xlu0 %1150 }
 0x239   :  { %1764 = vperm.xlu0 %2786, %v1469_v36  }
 0x23b   :  { %v4222_v8 = vpop.permute.xlu1 %1146  ;;  %1761 = vperm.xlu1 %2787, %v1468_v55  }
 0x23c   :  { %v4224_v59 = vpop.permute.xlu0 %1158 }
 0x23d   :  { %1770 = vperm.xlu0 %2786, %v1471_v2   ;;  %v5058_v2 = vld [vmem:[#allocation12_spill] sm:$0xff] }
 0x23f   :  { %v4230_v62 = vpop.permute.xlu1 %1154  ;;  %1767 = vperm.xlu1 %2787, %v1470_v4   ;;  %v5059_v4 = vld [vmem:[#allocation113_spill] sm:$0xff] }
 0x240   :  { %v4232_v7 = vpop.permute.xlu0 %1166 }
 0x241   :  { %1776 = vperm.xlu0 %2786, %v1473_v40   ;;  %v1482_v40 = vadd.f32 %v5059_v4, %v5058_v2  ;;  %v5072_v2 = vld [vmem:[#allocation19_spill] sm:$0xff] }
 0x242   :  { %v5073_v4 = vld [vmem:[#allocation123_spill] sm:$0xff] }
 0x243   :  { %v4238_v27 = vpop.permute.xlu1 %1162  ;;  %1773 = vperm.xlu1 %2787, %v1472_v16   ;;  %v5060_v16 = vld [vmem:[#allocation13_spill] sm:$0xff] }
 0x244   :  { %v4240_v19 = vpop.permute.xlu0 %1174 }
 0x245   :  { %1782 = vperm.xlu0 %2786, %v1475_v21   ;;  %v5061_v21 = vld [vmem:[#allocation117_spill] sm:$0xff] }
 0x247   :  { %v4246_v56 = vpop.permute.xlu1 %1170  ;;  %1779 = vperm.xlu1 %2787, %v1474_v28   ;;  %v1485_v28 = vadd.f32 %v5061_v21, %v5060_v16 }
 0x248   :  { %v4248_v32 = vpop.permute.xlu0 %1182 }
 0x249   :  { %1788 = vperm.xlu0 %2786, %v1477_v52   ;;  %v5062_v52 = vld [vmem:[#allocation14_spill] sm:$0xff] }
 0x24a   :  { %v1484_v45 = vadd.f32 %v5063_v25, %v5062_v52  ;;  %v5076_v52 = vld [vmem:[#allocation120_spill] sm:$0xff] }
 0x24b   :  { %v4254_v44 = vpop.permute.xlu1 %1178  ;;  %1785 = vperm.xlu1 %2787, %v1476_v43   ;;  %v5065_v43 = vld [vmem:[#allocation119_spill] sm:$0xff] }
 0x24c   :  { %v4256_v49 = vpop.permute.xlu0 %1193  ;;  %v1487_v1 = vadd.f32 %v5065_v43, %v5064_v11  ;;  %v5078_v11 = vld [vmem:[#allocation125_spill] sm:$0xff] }
 0x24d   :  { %1794 = vperm.xlu0 %2786, %v1479_v63  }
 0x24f   :  { %v4262_v10 = vpop.permute.xlu1 %1186  ;;  %1791 = vperm.xlu1 %2787, %v1478_v54   ;;  %v1486_v54 = vadd.f32 %v5067_v26, %v5066_v6  ;;  %v5080_v26 = vld [vmem:[#allocation22_spill] sm:$0xff] }
 0x250   :  { %v4264_v48 = vpop.permute.xlu0 %1201 }
 0x251   :  { %1800 = vperm.xlu0 %2786, %v1481_v14   ;;  %v1489_v14 = vadd.f32 %v5069_v0, %v5068_v24  ;;  %v5082_v0 = vld [vmem:[#allocation23_spill] sm:$0xff] }
 0x253   :  { %v4270_v36 = vpop.permute.xlu1 %1197  ;;  %1797 = vperm.xlu1 %2787, %v1480_v30   ;;  %v5070_v30 = vld [vmem:[#allocation18_spill] sm:$0xff] }
 0x254   :  { %v4272_v55 = vpop.permute.xlu0 %1209 }
 0x255   :  { %1806 = vperm.xlu0 %2786, %v1483_v42   ;;  %v1488_v42 = vadd.f32 %v5071_v22, %v5070_v30 }
 0x257   :  { %v4278_v50 = vpop.permute.xlu1 %1205  ;;  %1803 = vperm.xlu1 %2787, %v1482_v40   ;;  %v1491_v40 = vadd.f32 %v5073_v4, %v5072_v2  ;;  %v5086_v2 = vld [vmem:[#allocation24_spill] sm:$0xff] }
 0x258   :  { %v4280_v17 = vpop.permute.xlu0 %1217  ;;  %v5087_v4 = vld [vmem:[#allocation124_spill] sm:$0xff] }
 0x259   :  { %1812 = vperm.xlu0 %2786, %v1485_v28   ;;  %v5075_v28 = vld [vmem:[#allocation20_spill] sm:$0xff] }
 0x25a   :  { %v1490_v25 = vadd.f32 %v5076_v52, %v5075_v28  ;;  %v5088_v28 = vld [vmem:[#allocation25_spill] sm:$0xff] }
 0x25b   :  { %v4286_v37 = vpop.permute.xlu1 %1213  ;;  %1809 = vperm.xlu1 %2787, %v1484_v45   ;;  %v5077_v45 = vld [vmem:[#allocation21_spill] sm:$0xff] }
 0x25c   :  { %v4288_v63 = vpop.permute.xlu0 %1225  ;;  %v1493_v43 = vadd.f32 %v5078_v11, %v5077_v45  ;;  %v5089_v52 = vld [vmem:[#allocation129_spill] sm:$0xff] }
 0x25d   :  { %1818 = vperm.xlu0 %2786, %v1487_v1  }
 0x25f   :  { %v4294_v20 = vpop.permute.xlu1 %1221  ;;  %1815 = vperm.xlu1 %2787, %v1486_v54   ;;  %v5081_v54 = vld [vmem:[#allocation122_spill] sm:$0xff] }
 0x260   :  { %v4296_v35 = vpop.permute.xlu0 %1233  ;;  %v1492_v24 = vadd.f32 %v5081_v54, %v5080_v26  ;;  %v5093_v26 = vld [vmem:[#allocation126_spill] sm:$0xff] }
 0x261   :  { %1824 = vperm.xlu0 %2786, %v1489_v14   ;;  %v5083_v14 = vld [vmem:[#allocation127_spill] sm:$0xff] }
 0x262   :  { %v1495_v30 = vadd.f32 %v5083_v14, %v5082_v0  ;;  %v5094_v0 = vld [vmem:[#allocation27_spill] sm:$0xff] }
 0x263   :  { %v4302_v16 = vpop.permute.xlu1 %1229  ;;  %1821 = vperm.xlu1 %2787, %v1488_v42  }
 0x264   :  { %v4304_v21 = vpop.permute.xlu0 %1241 }
 0x265   :  { %5074 = vst [vmem:[#allocation5_spill] sm:$0xff] %v4304_v21  ;;  %1830 = vperm.xlu0 %2786, %v1491_v40   ;;  %v1494_v40 = vadd.f32 %v5087_v4, %v5086_v2  ;;  %v5097_v4 = vld [vmem:[#allocation128_spill] sm:$0xff] }
 0x267   :  { %v4310_v1 = vpop.permute.xlu1 %1237  ;;  %1827 = vperm.xlu1 %2787, %v1490_v25   ;;  %v1497_v25 = vadd.f32 %v5089_v52, %v5088_v28  ;;  %v5098_v52 = vld [vmem:[#allocation29_spill] sm:$0xff] }
 0x268   :  { %v4312_v6 = vpop.permute.xlu0 %1249 }
 0x269   :  { %5079 = vst [vmem:[#allocation110_spill] sm:$0xff] %v4312_v6  ;;  %1836 = vperm.xlu0 %2786, %v1493_v43   ;;  %v5092_v43 = vld [vmem:[#allocation26_spill] sm:$0xff] }
 0x26a   :  { %v1496_v54 = vadd.f32 %v5093_v26, %v5092_v43  ;;  %v5102_v26 = vld [vmem:[#allocation130_spill] sm:$0xff] }
 0x26b   :  { %v4318_v22 = vpop.permute.xlu1 %1245  ;;  %1833 = vperm.xlu1 %2787, %v1492_v24   ;;  %v1499_v24 = vadd.f32 %v4108_v15, %v5094_v0  ;;  %v5103_v0 = vld [vmem:[#allocation31_spill] sm:$0xff] }
 0x26c   :  { %5084 = vst [vmem:[#allocation6_spill] sm:$0xff] %v4318_v22  ;;  %v4320_v42 = vpop.permute.xlu0 %1260 }
 0x26d   :  { %5085 = vst [vmem:[#allocation108_spill] sm:$0xff] %v4320_v42  ;;  %1842 = vperm.xlu0 %2786, %v1495_v30   ;;  %v5096_v30 = vld [vmem:[#allocation28_spill] sm:$0xff] }
 0x26e   :  { %v1498_v28 = vadd.f32 %v5097_v4, %v5096_v30  ;;  %v5108_v4 = vld [vmem:[#allocation131_spill] sm:$0xff] }
 0x26f   :  { %v4326_v45 = vpop.permute.xlu1 %1253  ;;  %1839 = vperm.xlu1 %2787, %v1494_v40   ;;  %v1501_v40 = vadd.f32 %v4112_v61, %v5098_v52  ;;  %v5109_v52 = vld [vmem:[#allocation33_spill] sm:$0xff] }
 0x270   :  { %5090 = vst [vmem:[#allocation7_spill] sm:$0xff] %v4326_v45  ;;  %v4328_v11 = vpop.permute.xlu0 %1268 }
 0x271   :  { %5091 = vst [vmem:[#allocation112_spill] sm:$0xff] %v4328_v11  ;;  %1848 = vperm.xlu0 %2786, %v1497_v25   ;;  %v5101_v25 = vld [vmem:[#allocation30_spill] sm:$0xff] }
 0x272   :  { %v1500_v15 = vadd.f32 %v5102_v26, %v5101_v25  ;;  %v5114_v26 = vld [vmem:[#allocation132_spill] sm:$0xff]  ;;  %v5160_v11 = vld [vmem:[#allocation62_spill] sm:$0xff] }
 0x273   :  { %v4334_v14 = vpop.permute.xlu1 %1264  ;;  %1845 = vperm.xlu1 %2787, %v1496_v54   ;;  %v5104_v54 = vld [vmem:[#allocation133_spill] sm:$0xff] }
 0x274   :  { %v4336_v2 = vpop.permute.xlu0 %1276  ;;  %v1503_v6 = vadd.f32 %v5104_v54, %v5103_v0  ;;  %v5115_v54 = vld [vmem:[#allocation35_spill] sm:$0xff] }
 0x275   :  { %5095 = vst [vmem:[#allocation8_spill] sm:$0xff] %v4336_v2  ;;  %1854 = vperm.xlu0 %2786, %v1499_v24   ;;  %v5107_v24 = vld [vmem:[#allocation32_spill] sm:$0xff] }
 0x276   :  { %v1502_v61 = vadd.f32 %v5108_v4, %v5107_v24  ;;  %v5118_v24 = vld [vmem:[#allocation36_spill] sm:$0xff] }
 0x277   :  { %v4342_v45 = vpop.permute.xlu1 %1272  ;;  %1851 = vperm.xlu1 %2787, %v1498_v28   ;;  %v5110_v28 = vld [vmem:[#allocation135_spill] sm:$0xff] }
 0x278   :  { %5099 = vst [vmem:[#allocation109_spill] sm:$0xff] %v4342_v45  ;;  %v4344_v43 = vpop.permute.xlu0 %1284  ;;  %v1505_v21 = vadd.f32 %v5110_v28, %v5109_v52  ;;  %v5121_v28 = vld [vmem:[#allocation37_spill] sm:$0xff] }
 0x279   :  { %5100 = vst [vmem:[#allocation9_spill] sm:$0xff] %v4344_v43  ;;  %1860 = vperm.xlu0 %2786, %v1501_v40   ;;  %v5113_v40 = vld [vmem:[#allocation34_spill] sm:$0xff] }
 0x27a   :  { %v1504_v0 = vadd.f32 %v5114_v26, %v5113_v40  ;;  %v5124_v40 = vld [vmem:[#allocation38_spill] sm:$0xff] }
 0x27b   :  { %v4350_v22 = vpop.permute.xlu1 %1280  ;;  %1857 = vperm.xlu1 %2787, %v1500_v15   ;;  %v5116_v15 = vld [vmem:[#allocation137_spill] sm:$0xff] }
 0x27c   :  { %5105 = vst [vmem:[#allocation114_spill] sm:$0xff] %v4350_v22  ;;  %v4352_v30 = vpop.permute.xlu0 %1292  ;;  %v1507_v2 = vadd.f32 %v5116_v15, %v5115_v54  ;;  %v5126_v54 = vld [vmem:[#allocation39_spill] sm:$0xff]  ;;  %v5127_v15 = vld [vmem:[#allocation141_spill] sm:$0xff] }
 0x27d   :  { %5106 = vst [vmem:[#allocation10_spill] sm:$0xff] %v4352_v30  ;;  %1866 = vperm.xlu0 %2786, %v1503_v6   ;;  %v5119_v6 = vld [vmem:[#allocation134_spill] sm:$0xff]  ;;  %v5159_v22 = vld [vmem:[#allocation61_spill] sm:$0xff] }
 0x27e   :  { %v1506_v4 = vadd.f32 %v5119_v6, %v5118_v24  ;;  %v5131_v6 = vld [vmem:[#allocation138_spill] sm:$0xff] }
 0x27f   :  { %v4358_v43 = vpop.permute.xlu1 %1288  ;;  %1863 = vperm.xlu1 %2787, %v1502_v61   ;;  %v5122_v61 = vld [vmem:[#allocation139_spill] sm:$0xff] }
 0x280   :  { %5111 = vst [vmem:[#allocation111_spill] sm:$0xff] %v4358_v43  ;;  %v4360_v25 = vpop.permute.xlu0 %1300  ;;  %v1509_v43 = vadd.f32 %v5122_v61, %v5121_v28  ;;  %v5132_v28 = vld [vmem:[#allocation42_spill] sm:$0xff] }
 0x281   :  { %5112 = vst [vmem:[#allocation11_spill] sm:$0xff] %v4360_v25  ;;  %1872 = vperm.xlu0 %2786, %v1505_v21   ;;  %v5125_v21 = vld [vmem:[#allocation136_spill] sm:$0xff]  ;;  %v1513_v61 = vadd.f32 %v4136_v51, %v5132_v28  ;;  %v5139_v28 = vld [vmem:[#allocation46_spill] sm:$0xff] }
 0x282   :  { %v1508_v26 = vadd.f32 %v5125_v21, %v5124_v40  ;;  %v5135_v21 = vld [vmem:[#allocation140_spill] sm:$0xff] }
 0x283   :  { %v4366_v30 = vpop.permute.xlu1 %1296  ;;  %1869 = vperm.xlu1 %2787, %v1504_v0  }
 0x284   :  { %5117 = vst [vmem:[#allocation12_spill] sm:$0xff] %v4366_v30  ;;  %v4370_v52 = vpop.permute.xlu0 %1308  ;;  %v1511_v30 = vadd.f32 %v5127_v15, %v5126_v54  ;;  %v5136_v15 = vld [vmem:[#allocation44_spill] sm:$0xff] }
 0x285   :  { %1878 = vperm.xlu0 %2786, %v1507_v2   ;;  %5120 = vst [vmem:[#allocation113_spill] sm:$0xff] %v4370_v52  ;;  %v5130_v2 = vld [vmem:[#allocation41_spill] sm:$0xff] }
 0x286   :  { %v1510_v52 = vadd.f32 %v5131_v6, %v5130_v2  ;;  %v5138_v6 = vld [vmem:[#allocation142_spill] sm:$0xff] }
 0x287   :  { %v4374_v25 = vpop.permute.xlu1 %1304  ;;  %1875 = vperm.xlu1 %2787, %v1506_v4  }
 0x288   :  { %5123 = vst [vmem:[#allocation13_spill] sm:$0xff] %v4374_v25  ;;  %v4382_v24 = vpop.permute.xlu0 %1316 }
 0x289   :  { %1884 = vperm.xlu0 %2786, %v1509_v43   ;;  %5129 = vst [vmem:[#allocation14_spill] sm:$0xff] %v4382_v24  ;;  %v5134_v43 = vld [vmem:[#allocation43_spill] sm:$0xff] }
 0x28a   :  { %v1512_v54 = vadd.f32 %v5135_v21, %v5134_v43  ;;  %v5141_v21 = vld [vmem:[#allocation143_spill] sm:$0xff] }
 0x28b   :  { %v4380_v0 = vpop.permute.xlu1 %1312  ;;  %1881 = vperm.xlu1 %2787, %v1508_v26   ;;  %v1515_v26 = vadd.f32 %v4142_v60, %v5136_v15  ;;  %v5142_v15 = vld [vmem:[#allocation48_spill] sm:$0xff] }
 0x28c   :  { %5128 = vst [vmem:[#allocation117_spill] sm:$0xff] %v4380_v0 }
 0x28d   :  { %1890 = vperm.xlu0 %2786, %v1511_v30   ;;  %v5137_v30 = vld [vmem:[#allocation45_spill] sm:$0xff] }
 0x28e   :  { %v1514_v51 = vadd.f32 %v5138_v6, %v5137_v30  ;;  %v5144_v6 = vld [vmem:[#allocation50_spill] sm:$0xff] }
 0x28f   :  { %v4388_v4 = vpop.permute.xlu1 %1320  ;;  %1887 = vperm.xlu1 %2787, %v1510_v52   ;;  %v1517_v52 = vadd.f32 %v4150_v9, %v5139_v28 }
 0x290   :  { %5133 = vst [vmem:[#allocation115_spill] sm:$0xff] %v4388_v4  ;;  %v4390_v40 = vpop.permute.xlu0 %1707 }
 0x291   :  { %1896 = vperm.xlu0 %2786, %v1513_v61   ;;  %v5140_v61 = vld [vmem:[#allocation47_spill] sm:$0xff] }
 0x292   :  { %v1516_v60 = vadd.f32 %v5141_v21, %v5140_v61  ;;  %v5146_v21 = vld [vmem:[#allocation52_spill] sm:$0xff] }
 0x293   :  { %v4396_v24 = vpop.permute.xlu1 %1710  ;;  %1893 = vperm.xlu1 %2787, %v1512_v54   ;;  %v1519_v54 = vadd.f32 %v4158_v41, %v5142_v15 }
 0x294   :  { %v4398_v2 = vpop.permute.xlu0 %1716 }
 0x295   :  { %1902 = vperm.xlu0 %2786, %v1515_v26   ;;  %v5143_v26 = vld [vmem:[#allocation49_spill] sm:$0xff] }
 0x296   :  { %v1518_v9 = vadd.f32 %v4144_v31, %v5143_v26  ;;  %v5148_v26 = vld [vmem:[#allocation54_spill] sm:$0xff] }
 0x297   :  { %v4404_v4 = vpop.permute.xlu1 %1713  ;;  %1899 = vperm.xlu1 %2787, %v1514_v51   ;;  %v1521_v51 = vadd.f32 %v4166_v58, %v5144_v6 }
 0x298   :  { %v4406_v43 = vpop.permute.xlu0 %1722 }
 0x299   :  { %1908 = vperm.xlu0 %2786, %v1517_v52   ;;  %v5145_v52 = vld [vmem:[#allocation51_spill] sm:$0xff] }
 0x29a   :  { %v1520_v41 = vadd.f32 %v4152_v12, %v5145_v52  ;;  %v5151_v52 = vld [vmem:[#allocation56_spill] sm:$0xff] }
 0x29b   :  { %v4412_v0 = vpop.permute.xlu1 %1719  ;;  %1905 = vperm.xlu1 %2787, %v1516_v60   ;;  %v1523_v60 = vadd.f32 %v4174_v29, %v5146_v21 }
 0x29c   :  { %v4414_v30 = vpop.permute.xlu0 %1728 }
 0x29d   :  { %1914 = vperm.xlu0 %2786, %v1519_v54   ;;  %v5147_v54 = vld [vmem:[#allocation53_spill] sm:$0xff] }
 0x29e   :  { %v1522_v58 = vadd.f32 %v4160_v47, %v5147_v54  ;;  %v5154_v54 = vld [vmem:[#allocation58_spill] sm:$0xff] }
 0x29f   :  { %v4420_v28 = vpop.permute.xlu1 %1725  ;;  %1911 = vperm.xlu1 %2787, %v1518_v9   ;;  %v1525_v9 = vadd.f32 %v4182_v5, %v5148_v26  ;;  %v5155_v26 = vlaneseq }
 0x2a0   :  { %v4422_v61 = vpop.permute.xlu0 %1734 }
 0x2a1   :  { %1920 = vperm.xlu0 %2786, %v1521_v51   ;;  %v5150_v51 = vld [vmem:[#allocation55_spill] sm:$0xff]  ;;  %v4453_v25 = vand.u32 127, %v5155_v26 }
 0x2a2   :  { %v1524_v29 = vadd.f32 %v4168_v34, %v5150_v51 }
 0x2a3   :  { %v4428_v15 = vpop.permute.xlu1 %1731  ;;  %1917 = vperm.xlu1 %2787, %v1520_v41   ;;  %v1527_v41 = vadd.f32 %v4190_v38, %v5151_v52  ;;  %v5156_v38 = vld [vmem:[#allocation59_spill] sm:$0xff]  ;;  %v2103_v52 = vadd.s32 4294967280, %v4453_v25 }
 0x2a4   :  { %v4430_v31 = vpop.permute.xlu0 %1740  ;;  %v1528_v51 = vadd.f32 %v4184_v3, %v5156_v38  ;;  %v1530_v3 = vadd.f32 %v4192_v13, %v5159_v22 }
 0x2a5   :  { %1926 = vperm.xlu0 %2786, %v1523_v60   ;;  %v5153_v60 = vld [vmem:[#allocation57_spill] sm:$0xff] }
 0x2a6   :  { %v1526_v5 = vadd.f32 %v4176_v57, %v5153_v60  ;;  %v5157_v57 = vld [vmem:[#allocation60_spill] sm:$0xff] }
 0x2a7   :  { %v4436_v6 = vpop.permute.xlu1 %1737  ;;  %1923 = vperm.xlu1 %2787, %v1522_v58   ;;  %v1529_v58 = vadd.f32 %v4198_v53, %v5154_v54  ;;  %v5158_v60 = vld [vmem:[#allocation40_spill] sm:$0xff] }
 0x2a8   :  { %v4438_v12 = vpop.permute.xlu0 %1746  ;;  %v4465_v53 = vsub.s32 %v4453_v25, %v5158_v60 }
 0x2a9   :  { %5149 = vst [vmem:[#allocation15_spill] sm:$0xff] %v4438_v12  ;;  %1932 = vperm.xlu0 %2786, %v1525_v9  }
 0x2ab   :  { %v4444_v21 = vpop.permute.xlu1 %1743  ;;  %1929 = vperm.xlu1 %2787, %v1524_v29   ;;  %v2096_v29 = vadd.s32 4294967288, %v4453_v25 }
 0x2ac   :  { %v4446_v47 = vpop.permute.xlu0 %1752 }
 0x2ad   :  { %5152 = vst [vmem:[#allocation119_spill] sm:$0xff] %v4446_v47  ;;  %1938 = vperm.xlu0 %2786, %v1527_v41   ;;  %v1531_v41 = vadd.f32 %v4206_v39, %v5157_v57  ;;  %v4471_v38 = vsub.s32 %v2096_v29, %v5158_v60  ;;  %v4475_v39 = vsub.s32 %v2103_v52, %v5158_v60  ;;  %v2117_v57 = vadd.s32 4294967264, %v4453_v25 }
 0x2af   :  { %v4455_v34 = vpop.permute.xlu1 %1749  ;;  %1935 = vperm.xlu1 %2787, %v1526_v5   ;;  %v2110_v5 = vadd.s32 4294967272, %v4453_v25 }
 0x2b0   :  { %v1759_v9 = vpop.permute.xlu0 %1758 }
 0x2b1   :  { %1944 = vperm.xlu0 %2786, %v1529_v58   ;;  %v2208_v47 = vrot.slane %v1759_v9, %v4471_v38  ;;  %v4482_v13 = vsub.s32 %v2110_v5, %v5158_v60  ;;  %v5162_v5 = vld [vmem:[#allocation64_spill] sm:$0xff] }
 0x2b3   :  { %v1756_v54 = vpop.permute.xlu1 %1755  ;;  %1941 = vperm.xlu1 %2787, %v1528_v51   ;;  %v1533_v51 = vadd.f32 %v4214_v18, %v5160_v11  ;;  %v4490_v18 = vsub.s32 %v2117_v57, %v5158_v60  ;;  %v2131_v11 = vadd.s32 4294967248, %v4453_v25 }
 0x2b4   :  { %v1765_v26 = vpop.permute.xlu0 %1764  ;;  %v2204_v58 = vrot.slane %v1756_v54, %v4465_v53  ;;  %v2124_v54 = vadd.s32 4294967256, %v4453_v25 }
 0x2b5   :  { %1950 = vperm.xlu0 %2786, %v1531_v41   ;;  %v5161_v41 = vld [vmem:[#allocation63_spill] sm:$0xff] }
 0x2b6   :  { %v1532_v52 = vadd.f32 %v4200_v23, %v5161_v41  ;;  %v2209_v42 = vsel %vm2101_vm1, %v2208_v47, %v2204_v58  ;;  %v2138_v23 = vadd.s32 4294967240, %v4453_v25  ;;  %v4502_v41 = vsub.s32 %v2124_v54, %v5158_v60 }
 0x2b7   :  { %v1762_v45 = vpop.permute.xlu1 %1761  ;;  %1947 = vperm.xlu1 %2787, %v1530_v3   ;;  %v2218_v3 = vrot.slane %v1765_v26, %v4482_v13  ;;  %v2145_v26 = vadd.s32 4294967232, %v4453_v25 }
 0x2b8   :  { %v2213_v22 = vrot.slane %v1762_v45, %v4475_v39  ;;  %v1771_v29 = vpop.permute.xlu0 %1770  ;;  %v1535_v45 = vadd.f32 %v4222_v8, %v5162_v5  ;;  %v4506_v8 = vsub.s32 %v2131_v11, %v5158_v60  ;;  %v4514_v54 = vsub.s32 %v2138_v23, %v5158_v60  ;;  %v5165_v11 = vld [vmem:[#allocation67_spill] sm:$0xff] }
 0x2b9   :  { %1956 = vperm.xlu0 %2786, %v1533_v51   ;;  %v5163_v51 = vld [vmem:[#allocation65_spill] sm:$0xff]  ;;  %v2228_v5 = vrot.slane %v1771_v29, %v4502_v41  ;;  %v2159_v29 = vadd.s32 4294967216, %v4453_v25 }
 0x2ba   :  { %v2214_v9 = vsel %vm2108_vm2, %v2213_v22, %v2209_v42  ;;  %v1534_v57 = vadd.f32 %v4208_v33, %v5163_v51 }
 0x2bb   :  { %v1768_v12 = vpop.permute.xlu1 %1767  ;;  %1953 = vperm.xlu1 %2787, %v1532_v52   ;;  %v2219_v42 = vsel %vm2115_vm3, %v2218_v3, %v2214_v9  ;;  %v5164_v52 = vld [vmem:[#allocation66_spill] sm:$0xff]  ;;  %v1536_v3 = vadd.f32 %v4216_v46, %v5165_v11  ;;  %v2166_v46 = vadd.s32 4294967208, %v4453_v25 }
 0x2bc   :  { %v2223_v47 = vrot.slane %v1768_v12, %v4490_v18  ;;  %v1777_v58 = vpop.permute.xlu0 %1776  ;;  %v1537_v12 = vadd.f32 %v4230_v62, %v5164_v52  ;;  %v4522_v62 = vsub.s32 %v2145_v26, %v5158_v60 }
 0x2bd   :  { %1962 = vperm.xlu0 %2786, %v1535_v45   ;;  %v2238_v52 = vrot.slane %v1777_v58, %v4514_v54  ;;  %v2173_v58 = vadd.s32 4294967200, %v4453_v25 }
 0x2be   :  { %v2224_v22 = vsel %vm2122_vm4, %v2223_v47, %v2219_v42  ;;  %v2152_v47 = vadd.s32 4294967224, %v4453_v25 }
 0x2bf   :  { %v1774_v33 = vpop.permute.xlu1 %1773  ;;  %1959 = vperm.xlu1 %2787, %v1534_v57   ;;  %v2229_v51 = vsel %vm2129_vm5, %v2228_v5, %v2224_v22  ;;  %v5166_v57 = vld [vmem:[#allocation68_spill] sm:$0xff]  ;;  %v5167_v5 = vld [vmem:[#allocation69_spill] sm:$0xff] }
 0x2c0   :  { %v2233_v9 = vrot.slane %v1774_v33, %v4506_v8  ;;  %v1783_v45 = vpop.permute.xlu0 %1782  ;;  %v1539_v42 = vadd.f32 %v4238_v27, %v5166_v57  ;;  %v1538_v26 = vadd.f32 %v4224_v59, %v5167_v5  ;;  %v4534_v11 = vsub.s32 %v2152_v47, %v5158_v60 }
 0x2c1   :  { %1968 = vperm.xlu0 %2786, %v1537_v12   ;;  %v4538_v27 = vsub.s32 %v2159_v29, %v5158_v60  ;;  %v4546_v47 = vsub.s32 %v2166_v46, %v5158_v60  ;;  %v5169_v29 = vld [vmem:[#allocation71_spill] sm:$0xff] }
 0x2c2   :  { %v2234_v23 = vsel %vm2136_vm6, %v2233_v9, %v2229_v51  ;;  %v5168_v51 = vld [vmem:[#allocation70_spill] sm:$0xff] }
 0x2c3   :  { %v1780_v33 = vpop.permute.xlu1 %1779  ;;  %1965 = vperm.xlu1 %2787, %v1536_v3   ;;  %v2239_v9 = vsel %vm2143_vm7, %v2238_v52, %v2234_v23  ;;  %v1541_v57 = vadd.f32 %v4246_v56, %v5168_v51  ;;  %v1540_v52 = vadd.f32 %v4232_v7, %v5169_v29  ;;  %v4554_v56 = vsub.s32 %v2173_v58, %v5158_v60 }
 0x2c4   :  { %v2243_v22 = vrot.slane %v1780_v33, %v4522_v62  ;;  %v1789_v12 = vpop.permute.xlu0 %1788  ;;  %v2248_v33 = vrot.slane %v1783_v45, %v4534_v11  ;;  %v2187_v45 = vadd.s32 4294967184, %v4453_v25  ;;  %v2194_v51 = vadd.s32 4294967176, %v4453_v25 }
 0x2c5   :  { %1974 = vperm.xlu0 %2786, %v1539_v42   ;;  %v2258_v7 = vrot.slane %v1789_v12, %v4546_v47  ;;  %v5172_v12 = vld [vmem:[#allocation74_spill] sm:$0xff] }
 0x2c6   :  { %v2244_v3 = vsel %vm2150_vm8, %v2243_v22, %v2239_v9  ;;  %v2180_v22 = vadd.s32 4294967192, %v4453_v25 }
 0x2c7   :  { %v1786_v59 = vpop.permute.xlu1 %1785  ;;  %1971 = vperm.xlu1 %2787, %v1538_v26   ;;  %v2249_v5 = vsel %vm2157_vm9, %v2248_v33, %v2244_v3  ;;  %v5170_v26 = vld [vmem:[#allocation72_spill] sm:$0xff]  ;;  %v5171_v33 = vld [vmem:[#allocation73_spill] sm:$0xff] }
 0x2c8   :  { %v2253_v23 = vrot.slane %v1786_v59, %v4538_v27  ;;  %v1795_v42 = vpop.permute.xlu0 %1794  ;;  %v1543_v9 = vadd.f32 %v4254_v44, %v5170_v26  ;;  %v1542_v58 = vadd.f32 %v4240_v19, %v5171_v33  ;;  %v4566_v29 = vsub.s32 %v2180_v22, %v5158_v60 }
 0x2c9   :  { %1980 = vperm.xlu0 %2786, %v1541_v57   ;;  %v4570_v44 = vsub.s32 %v2187_v45, %v5158_v60 }
 0x2ca   :  { %v2254_v46 = vsel %vm2164_vm10, %v2253_v23, %v2249_v5  ;;  %v4576_v5 = vsub.s32 %v2194_v51, %v5158_v60  ;;  %v2268_v19 = vrot.slane %v1795_v42, %v4566_v29  ;;  %v5174_v42 = vld [vmem:[#allocation76_spill] sm:$0xff] }
 0x2cb   :  { %v1792_v59 = vpop.permute.xlu1 %1791  ;;  %1977 = vperm.xlu1 %2787, %v1540_v52   ;;  %v2259_v23 = vsel %vm2171_vm11, %v2258_v7, %v2254_v46  ;;  %v1545_v52 = vadd.f32 %v4262_v10, %v5172_v12  ;;  %v2100_v10 = vrot.slane %v4396_v24, %v4471_v38  ;;  %v1547_v51 = vadd.f32 %v4270_v36, %v5174_v42 }
 0x2cc   :  { %v2263_v3 = vrot.slane %v1792_v59, %v4554_v56  ;;  %v1801_v57 = vpop.permute.xlu0 %1800 }
 0x2cd   :  { %1986 = vperm.xlu0 %2786, %v1543_v9   ;;  %v5173_v9 = vld [vmem:[#allocation75_spill] sm:$0xff]  ;;  %v2278_v7 = vrot.slane %v1801_v57, %v4576_v5  ;;  %v2095_v57 = vrot.slane %v4390_v40, %v4465_v53  ;;  %v2121_v40 = vrot.slane %v4412_v0, %v4490_v18 }
 0x2ce   :  { %v2264_v25 = vsel %vm4905_vm12, %v2263_v3, %v2259_v23  ;;  %v1544_v45 = vadd.f32 %v4248_v32, %v5173_v9  ;;  %v2107_v3 = vrot.slane %v4404_v4, %v4475_v39 }
 0x2cf   :  { %v1798_v26 = vpop.permute.xlu1 %1797  ;;  %1983 = vperm.xlu1 %2787, %v1542_v58   ;;  %v2269_v59 = vsel %vm2185_vm13, %v2268_v19, %v2264_v25  ;;  %v5175_v25 = vld [vmem:[#allocation77_spill] sm:$0xff]  ;;  %v2102_v36 = vsel %vm2101_vm1, %v2100_v10, %v2095_v57 }
 0x2d0   :  { %v2273_v22 = vrot.slane %v1798_v26, %v4570_v44  ;;  %v1807_v46 = vpop.permute.xlu0 %1806  ;;  %v1546_v12 = vadd.f32 %v4256_v49, %v5175_v25  ;;  %v2109_v26 = vsel %vm2108_vm2, %v2107_v3, %v2102_v36  ;;  %v5180_v25 = vld [vmem:[#allocation82_spill] sm:$0xff] }
 0x2d1   :  { %1992 = vperm.xlu0 %2786, %v1545_v52   ;;  %v2287_v58 = vrot.slane %v1807_v46, %v4471_v38  ;;  %v5176_v52 = vld [vmem:[#allocation78_spill] sm:$0xff]  ;;  %v2114_v46 = vrot.slane %v4398_v2, %v4482_v13  ;;  %v2135_v2 = vrot.slane %v4420_v28, %v4506_v8 }
 0x2d2   :  { %v2274_v60 = vsel %vm2192_vm14, %v2273_v22, %v2269_v59  ;;  %v1549_v19 = vadd.f32 %v4278_v50, %v5176_v52 }
 0x2d3   :  { %v4592_v32 = vsel %vm2199_vm15, %v2278_v7, %v2274_v60  ;;  %v1804_v33 = vpop.permute.xlu1 %1803  ;;  %1989 = vperm.xlu1 %2787, %v1544_v45   ;;  %v5177_v45 = vld [vmem:[#allocation79_spill] sm:$0xff]  ;;  %v2116_v50 = vsel %vm2115_vm3, %v2114_v46, %v2109_v26  ;;  %v5178_v60 = vld [vmem:[#allocation80_spill] sm:$0xff] }
 0x2d4   :  { %v2283_v24 = vrot.slane %v1804_v33, %v4465_v53  ;;  %v1813_v23 = vpop.permute.xlu0 %1812  ;;  %v1548_v7 = vadd.f32 %v4264_v48, %v5177_v45  ;;  %v1551_v0 = vadd.f32 %v4286_v37, %v5178_v60  ;;  %v2123_v42 = vsel %vm2122_vm4, %v2121_v40, %v2116_v50  ;;  %v5181_v40 = vld [vmem:[#allocation83_spill] sm:$0xff]  ;;  %v5183_v60 = vld [vmem:[#allocation85_spill] sm:$0xff] }
 0x2d5   :  { %1998 = vperm.xlu0 %2786, %v1547_v51   ;;  %v2297_v59 = vrot.slane %v1813_v23, %v4482_v13  ;;  %v2128_v48 = vrot.slane %v4406_v43, %v4502_v41  ;;  %v2149_v43 = vrot.slane %v4428_v15, %v4522_v62 }
 0x2d6   :  { %v2288_v4 = vsel %vm2101_vm1, %v2287_v58, %v2283_v24  ;;  %v5179_v58 = vld [vmem:[#allocation81_spill] sm:$0xff] }
 0x2d7   :  { %v1810_v22 = vpop.permute.xlu1 %1809  ;;  %1995 = vperm.xlu1 %2787, %v1546_v12   ;;  %v1550_v24 = vadd.f32 %v4272_v55, %v5179_v58  ;;  %v2130_v23 = vsel %vm2129_vm5, %v2128_v48, %v2123_v42  ;;  %v1553_v12 = vadd.f32 %v4294_v20, %v5180_v25  ;;  %v2142_v55 = vrot.slane %v4414_v30, %v4514_v54 }
 0x2d8   :  { %v2292_v49 = vrot.slane %v1810_v22, %v4475_v39  ;;  %v1819_v9 = vpop.permute.xlu0 %1818  ;;  %v2137_v36 = vsel %vm2136_vm6, %v2135_v2, %v2130_v23  ;;  %v1552_v22 = vadd.f32 %v4280_v17, %v5181_v40  ;;  %v2163_v30 = vrot.slane %v4436_v6, %v4538_v27  ;;  %v5184_v2 = vld [vmem:[#allocation86_spill] sm:$0xff] }
 0x2d9   :  { %2004 = vperm.xlu0 %2786, %v1549_v19   ;;  %v2307_v37 = vrot.slane %v1819_v9, %v4502_v41  ;;  %v2144_v46 = vsel %vm2143_vm7, %v2142_v55, %v2137_v36  ;;  %v2156_v17 = vrot.slane %v4422_v61, %v4534_v11  ;;  %v2177_v61 = vrot.slane %v4444_v21, %v4554_v56 }
 0x2da   :  { %v2293_v10 = vsel %vm2108_vm2, %v2292_v49, %v2288_v4  ;;  %v5182_v49 = vld [vmem:[#allocation84_spill] sm:$0xff]  ;;  %v2151_v45 = vsel %vm2150_vm8, %v2149_v43, %v2144_v46  ;;  %v5191_v46 = vld [vmem:[#allocation109_spill] sm:$0xff] }
 0x2db   :  { %v1816_v51 = vpop.permute.xlu1 %1815  ;;  %v2298_v3 = vsel %vm2115_vm3, %v2297_v59, %v2293_v10  ;;  %2001 = vperm.xlu1 %2787, %v1548_v7   ;;  %v1555_v9 = vadd.f32 %v4302_v16, %v5182_v49  ;;  %v2158_v42 = vsel %vm2157_vm9, %v2156_v17, %v2151_v45 }
 0x2dc   :  { %v2302_v33 = vrot.slane %v1816_v51, %v4490_v18  ;;  %v1825_v57 = vpop.permute.xlu0 %1824  ;;  %v1557_v51 = vadd.f32 %v4310_v1, %v5184_v2  ;;  %v5196_v2 = vld [vmem:[#allocation114_spill] sm:$0xff] }
 0x2dd   :  { %2010 = vperm.xlu0 %2786, %v1551_v0   ;;  %v2317_v20 = vrot.slane %v1825_v57, %v4514_v54  ;;  %v1554_v0 = vadd.f32 %v4288_v63, %v5183_v60  ;;  %v2170_v63 = vrot.slane %v4430_v31, %v4546_v47  ;;  %v2191_v31 = vrot.slane %v4455_v34, %v4570_v44 }
 0x2de   :  { %v2303_v28 = vsel %vm2122_vm4, %v2302_v33, %v2298_v3  ;;  %v2165_v3 = vsel %vm2164_vm10, %v2163_v30, %v2158_v42  ;;  %v5192_v30 = vld [vmem:[#allocation119_spill] sm:$0xff] }
 0x2df   :  { %v1822_v4 = vpop.permute.xlu1 %1821  ;;  %v2308_v52 = vsel %vm2129_vm5, %v2307_v37, %v2303_v28  ;;  %2007 = vperm.xlu1 %2787, %v1550_v24   ;;  %v5185_v24 = vld [vmem:[#allocation87_spill] sm:$0xff]  ;;  %v2172_v23 = vsel %vm2171_vm11, %v2170_v63, %v2165_v3  ;;  %v5186_v28 = vld [vmem:[#allocation92_spill] sm:$0xff] }
 0x2e0   :  { %v2312_v19 = vrot.slane %v1822_v4, %v4506_v8  ;;  %v1831_v26 = vpop.permute.xlu0 %1830  ;;  %v1556_v37 = vadd.f32 %v4296_v35, %v5185_v24  ;;  %v1563_v25 = vadd.f32 %v4334_v14, %v5186_v28  ;;  %v5187_v35 = vld [vmem:[#allocation15_spill] sm:$0xff]  ;;  %v5197_v24 = vld [vmem:[#allocation97_spill] sm:$0xff] }
 0x2e1   :  { %2016 = vperm.xlu0 %2786, %v1553_v12   ;;  %v2327_v16 = vrot.slane %v1831_v26, %v4534_v11  ;;  %v2179_v12 = vsel %vm4905_vm12, %v2177_v61, %v2172_v23  ;;  %v2184_v4 = vrot.slane %v5187_v35, %v4566_v29  ;;  %v5189_v26 = vld [vmem:[#allocation108_spill] sm:$0xff]  ;;  %v5200_v28 = vld [vmem:[#allocation111_spill] sm:$0xff] }
 0x2e2   :  { %v2313_v15 = vsel %vm2136_vm6, %v2312_v19, %v2308_v52  ;;  %v5188_v19 = vld [vmem:[#allocation93_spill] sm:$0xff] }
 0x2e3   :  { %v1828_v7 = vpop.permute.xlu1 %1827  ;;  %v2318_v59 = vsel %vm2143_vm7, %v2317_v20, %v2313_v15  ;;  %2013 = vperm.xlu1 %2787, %v1552_v22   ;;  %v1562_v40 = vadd.f32 %v5189_v26, %v5188_v19  ;;  %v2186_v22 = vsel %vm2185_vm13, %v2184_v4, %v2179_v12  ;;  %v5190_v20 = vld [vmem:[#allocation94_spill] sm:$0xff]  ;;  %v5204_v19 = vld [vmem:[#allocation12_spill] sm:$0xff] }
 0x2e4   :  { %v2322_v50 = vrot.slane %v1828_v7, %v4522_v62  ;;  %v1837_v10 = vpop.permute.xlu0 %1836  ;;  %v1565_v15 = vadd.f32 %v5191_v46, %v5190_v20  ;;  %v2193_v49 = vsel %vm2192_vm14, %v2191_v31, %v2186_v22  ;;  %v2198_v7 = vrot.slane %v5192_v30, %v4576_v5  ;;  %v5205_v20 = vld [vmem:[#allocation101_spill] sm:$0xff]  ;;  %v5206_v46 = vld [vmem:[#allocation10_spill] sm:$0xff] }
 0x2e5   :  { %2022 = vperm.xlu0 %2786, %v1555_v9   ;;  %v2337_v1 = vrot.slane %v1837_v10, %v4546_v47  ;;  %v5194_v10 = vld [vmem:[#allocation112_spill] sm:$0xff]  ;;  %v5208_v30 = vld [vmem:[#allocation5_spill] sm:$0xff] }
 0x2e6   :  { %v2323_v6 = vsel %vm2150_vm8, %v2322_v50, %v2318_v59  ;;  %v5193_v50 = vld [vmem:[#allocation95_spill] sm:$0xff] }
 0x2e7   :  { %v1834_v48 = vpop.permute.xlu1 %1833  ;;  %v2328_v33 = vsel %vm2157_vm9, %v2327_v16, %v2323_v6  ;;  %2019 = vperm.xlu1 %2787, %v1554_v0   ;;  %v1564_v60 = vadd.f32 %v5194_v10, %v5193_v50  ;;  %v2200_v16 = vsel %vm2199_vm15, %v2198_v7, %v2193_v49  ;;  %v5195_v6 = vld [vmem:[#allocation96_spill] sm:$0xff] }
 0x2e8   :  { %v2332_v57 = vrot.slane %v1834_v48, %v4538_v27  ;;  %v1843_v58 = vpop.permute.xlu0 %1842  ;;  %v2755_v3 = vsel %vm2754_vm0, %v4592_v32, %v2200_v16  ;;  %vm2758_vm0 = vcmask 1043459  }
 0x2e9   :  { %2028 = vperm.xlu0 %2786, %v1557_v51   ;;  %v2347_v14 = vrot.slane %v1843_v58, %v4566_v29  ;;  %v1567_v51 = vadd.f32 %v5196_v2, %v5195_v6  ;;  %v5211_v2 = vld [vmem:[#allocation88_spill] sm:$0xff] }
 0x2ea   :  { %v2333_v21 = vsel %vm2164_vm10, %v2332_v57, %v2328_v33 }
 0x2eb   :  { %v1840_v36 = vpop.permute.xlu1 %1839  ;;  %v2338_v43 = vsel %vm2171_vm11, %v2337_v1, %v2333_v21  ;;  %2025 = vperm.xlu1 %2787, %v1556_v37   ;;  %v5198_v37 = vld [vmem:[#allocation8_spill] sm:$0xff]  ;;  %v5199_v21 = vld [vmem:[#allocation98_spill] sm:$0xff] }
 0x2ec   :  { %v2342_v52 = vrot.slane %v1840_v36, %v4554_v56  ;;  %v1849_v55 = vpop.permute.xlu0 %1848  ;;  %v1566_v1 = vadd.f32 %v5198_v37, %v5197_v24  ;;  %v1569_v32 = vadd.f32 %v5200_v28, %v5199_v21  ;;  %v5201_v36 = vld [vmem:[#allocation99_spill] sm:$0xff]  ;;  %v5214_v24 = vld [vmem:[#allocation13_spill] sm:$0xff]  ;;  %v5216_v28 = vld [vmem:[#allocation110_spill] sm:$0xff] }
 0x2ed   :  { %2046 = vperm.xlu0 %2786, %v1563_v25   ;;  %v2357_v0 = vrot.slane %v1849_v55, %v4576_v5  ;;  %v5203_v55 = vld [vmem:[#allocation100_spill] sm:$0xff]  ;;  %v5215_v21 = vld [vmem:[#allocation91_spill] sm:$0xff] }
 0x2ee   :  { %v2343_v34 = vsel %vm4905_vm12, %v2342_v52, %v2338_v43  ;;  %vm2756_vm12 = vcmask 1042434   ;;  %v5202_v43 = vld [vmem:[#allocation9_spill] sm:$0xff]  ;;  %v1571_v26 = vadd.f32 %v5204_v19, %v5203_v55  ;;  %v5219_v19 = vld [vmem:[#allocation90_spill] sm:$0xff] }
 0x2ef   :  { %v1846_v9 = vpop.permute.xlu1 %1845  ;;  %v2348_v45 = vsel %vm2185_vm13, %v2347_v14, %v2343_v34  ;;  %2043 = vperm.xlu1 %2787, %v1562_v40   ;;  %v1568_v35 = vadd.f32 %v5202_v43, %v5201_v36  ;;  %v5217_v43 = vld [vmem:[#allocation105_spill] sm:$0xff] }
 0x2f0   :  { %v2352_v59 = vrot.slane %v1846_v9, %v4570_v44  ;;  %v1855_v17 = vpop.permute.xlu0 %1854 }
 0x2f1   :  { %2052 = vperm.xlu0 %2786, %v1565_v15   ;;  %v2366_v63 = vrot.slane %v1855_v17, %v4471_v38  ;;  %v1570_v15 = vadd.f32 %v5206_v46, %v5205_v20  ;;  %v5221_v46 = vld [vmem:[#allocation104_spill] sm:$0xff] }
 0x2f2   :  { %v2353_v42 = vsel %vm2192_vm14, %v2352_v59, %v2348_v45  ;;  %v5207_v45 = vld [vmem:[#allocation89_spill] sm:$0xff] }
 0x2f3   :  { %v2358_v61 = vsel %vm2199_vm15, %v2357_v0, %v2353_v42  ;;  %v1852_v48 = vpop.permute.xlu1 %1851  ;;  %2049 = vperm.xlu1 %2787, %v1564_v60   ;;  %v1558_v7 = vadd.f32 %v5208_v30, %v5207_v45  ;;  %v5209_v60 = vld [vmem:[#allocation103_spill] sm:$0xff]  ;;  %v5224_v30 = vld [vmem:[#allocation106_spill] sm:$0xff] }
 0x2f4   :  { %v4701_v33 = vsel %vm2756_vm12, %v2358_v61, %v2755_v3  ;;  %v2362_v57 = vrot.slane %v1852_v48, %v4465_v53  ;;  %v1861_v58 = vpop.permute.xlu0 %1860  ;;  %v5210_v0 = vld [vmem:[#allocation11_spill] sm:$0xff]  ;;  %vm5223_vm12 = vcmask 851712  }
 0x2f5   :  { %2058 = vperm.xlu0 %2786, %v1567_v51   ;;  %v2376_v4 = vrot.slane %v1861_v58, %v4482_v13  ;;  %v1572_v16 = vadd.f32 %v5210_v0, %v5209_v60  ;;  %v5212_v51 = vld [vmem:[#allocation6_spill] sm:$0xff]  ;;  %v5226_v0 = vld [vmem:[#allocation107_spill] sm:$0xff] }
 0x2f6   :  { %v2367_v23 = vsel %vm2101_vm1, %v2366_v63, %v2362_v57  ;;  %v1559_v3 = vadd.f32 %v5212_v51, %v5211_v2  ;;  %v5213_v58 = vld [vmem:[#allocation102_spill] sm:$0xff] }
 0x2f7   :  { %v1858_v25 = vpop.permute.xlu1 %1857  ;;  %2055 = vperm.xlu1 %2787, %v1566_v1   ;;  %v1573_v37 = vadd.f32 %v5214_v24, %v5213_v58 }
 0x2f8   :  { %v2371_v12 = vrot.slane %v1858_v25, %v4475_v39  ;;  %v1867_v31 = vpop.permute.xlu0 %1866 }
 0x2f9   :  { %2064 = vperm.xlu0 %2786, %v1569_v32   ;;  %v2386_v49 = vrot.slane %v1867_v31, %v4502_v41  ;;  %v1560_v32 = vadd.f32 %v5216_v28, %v5215_v21 }
 0x2fa   :  { %v2372_v52 = vsel %vm2108_vm2, %v2371_v12, %v2367_v23 }
 0x2fb   :  { %v1864_v40 = vpop.permute.xlu1 %1863  ;;  %v2377_v14 = vsel %vm2115_vm3, %v2376_v4, %v2372_v52  ;;  %2061 = vperm.xlu1 %2787, %v1568_v35   ;;  %v5218_v35 = vld [vmem:[#allocation113_spill] sm:$0xff] }
 0x2fc   :  { %v2381_v22 = vrot.slane %v1864_v40, %v4490_v18  ;;  %v1873_v34 = vpop.permute.xlu0 %1872  ;;  %v1574_v4 = vadd.f32 %v5218_v35, %v5217_v43 }
 0x2fd   :  { %2070 = vperm.xlu0 %2786, %v1571_v26   ;;  %v2396_v42 = vrot.slane %v1873_v34, %v4514_v54  ;;  %v5220_v26 = vld [vmem:[#allocation7_spill] sm:$0xff] }
 0x2fe   :  { %v2382_v9 = vsel %vm2122_vm4, %v2381_v22, %v2377_v14  ;;  %v1561_v40 = vadd.f32 %v5220_v26, %v5219_v19 }
 0x2ff   :  { %v1870_v59 = vpop.permute.xlu1 %1869  ;;  %v2387_v17 = vsel %vm2129_vm5, %v2386_v49, %v2382_v9  ;;  %2067 = vperm.xlu1 %2787, %v1570_v15   ;;  %v5222_v15 = vld [vmem:[#allocation117_spill] sm:$0xff] }
 0x300   :  { %v2391_v50 = vrot.slane %v1870_v59, %v4506_v8  ;;  %v1879_v10 = vpop.permute.xlu0 %1878  ;;  %v1575_v49 = vadd.f32 %v5222_v15, %v5221_v46 }
 0x301   :  { %2031 = vperm.xlu0 %2786, %v1558_v7   ;;  %v2406_v1 = vrot.slane %v1879_v10, %v4534_v11  ;;  %v5225_v7 = vld [vmem:[#allocation115_spill] sm:$0xff] }
 0x302   :  { %v2392_v6 = vsel %vm2136_vm6, %v2391_v50, %v2387_v17  ;;  %v1577_v59 = vadd.f32 %v5225_v7, %v5224_v30 }
 0x303   :  { %v1876_v61 = vpop.permute.xlu1 %1875  ;;  %v2397_v48 = vsel %vm2143_vm7, %v2396_v42, %v2392_v6  ;;  %2073 = vperm.xlu1 %2787, %v1572_v16   ;;  %v5227_v16 = vld [vmem:[#allocation14_spill] sm:$0xff] }
 0x304   :  { %v2401_v63 = vrot.slane %v1876_v61, %v4522_v62  ;;  %v1885_v57 = vpop.permute.xlu0 %1884  ;;  %v1576_v42 = vadd.f32 %v5227_v16, %v5226_v0 }
 0x305   :  { %2034 = vperm.xlu0 %2786, %v1559_v3   ;;  %v2416_v52 = vrot.slane %v1885_v57, %v4546_v47 }
 0x306   :  { %v2402_v23 = vsel %vm2150_vm8, %v2401_v63, %v2397_v48 }
 0x307   :  { %v1882_v25 = vpop.permute.xlu1 %1881  ;;  %v2407_v12 = vsel %vm2157_vm9, %v2406_v1, %v2402_v23  ;;  %2076 = vperm.xlu1 %2787, %v1573_v37  }
 0x308   :  { %v2411_v31 = vrot.slane %v1882_v25, %v4538_v27  ;;  %v1891_v36 = vpop.permute.xlu0 %1890 }
 0x309   :  { %2037 = vperm.xlu0 %2786, %v1560_v32   ;;  %v2426_v9 = vrot.slane %v1891_v36, %v4566_v29 }
 0x30a   :  { %v2412_v55 = vsel %vm2164_vm10, %v2411_v31, %v2407_v12 }
 0x30b   :  { %v1888_v14 = vpop.permute.xlu1 %1887  ;;  %v2417_v22 = vsel %vm2171_vm11, %v2416_v52, %v2412_v55  ;;  %2079 = vperm.xlu1 %2787, %v1574_v4  }
 0x30c   :  { %v2421_v34 = vrot.slane %v1888_v14, %v4554_v56  ;;  %v1897_v20 = vpop.permute.xlu0 %1896 }
 0x30d   :  { %2040 = vperm.xlu0 %2786, %v1561_v40   ;;  %v2436_v6 = vrot.slane %v1897_v20, %v4576_v5 }
 0x30e   :  { %v2422_v45 = vsel %vm5223_vm12, %v2421_v34, %v2417_v22 }
 0x30f   :  { %v1894_v17 = vpop.permute.xlu1 %1893  ;;  %v2427_v50 = vsel %vm2185_vm13, %v2426_v9, %v2422_v45  ;;  %2082 = vperm.xlu1 %2787, %v1575_v49  }
 0x310   :  { %v2431_v10 = vrot.slane %v1894_v17, %v4570_v44  ;;  %v1903_v60 = vpop.permute.xlu0 %1902 }
 0x311   :  { %2088 = vperm.xlu0 %2786, %v1577_v59   ;;  %v2445_v48 = vrot.slane %v1903_v60, %v4471_v38 }
 0x312   :  { %v2432_v2 = vsel %vm2192_vm14, %v2431_v10, %v2427_v50 }
 0x313   :  { %v2437_v51 = vsel %vm2199_vm15, %v2436_v6, %v2432_v2  ;;  %v1900_v3 = vpop.permute.xlu1 %1899  ;;  %2085 = vperm.xlu1 %2787, %v1576_v42  }
 0x314   :  { %v2759_v61 = vsel %vm2758_vm0, %v2437_v51, %v4701_v33  ;;  %v2441_v63 = vrot.slane %v1900_v3, %v4465_v53  ;;  %v1909_v57 = vpop.permute.xlu0 %1908  ;;  %vm2760_vm0 = vcmask 1044484  }
 0x315   :  { %v2455_v23 = vrot.slane %v1909_v57, %v4482_v13 }
 0x316   :  { %v2446_v58 = vsel %vm2101_vm1, %v2445_v48, %v2441_v63 }
 0x317   :  { %v1906_v24 = vpop.permute.xlu1 %1905 }
 0x318   :  { %v2450_v37 = vrot.slane %v1906_v24, %v4475_v39  ;;  %v1915_v1 = vpop.permute.xlu0 %1914 }
 0x319   :  { %v2465_v12 = vrot.slane %v1915_v1, %v4502_v41 }
 0x31a   :  { %v2451_v21 = vsel %vm2108_vm2, %v2450_v37, %v2446_v58 }
 0x31b   :  { %v1912_v28 = vpop.permute.xlu1 %1911  ;;  %v2456_v32 = vsel %vm2115_vm3, %v2455_v23, %v2451_v21 }
 0x31c   :  { %v2460_v33 = vrot.slane %v1912_v28, %v4490_v18  ;;  %v1921_v25 = vpop.permute.xlu0 %1920 }
 0x31d   :  { %v2475_v52 = vrot.slane %v1921_v25, %v4514_v54 }
 0x31e   :  { %v2461_v31 = vsel %vm2122_vm4, %v2460_v33, %v2456_v32 }
 0x31f   :  { %v1918_v36 = vpop.permute.xlu1 %1917  ;;  %v2466_v43 = vsel %vm2129_vm5, %v2465_v12, %v2461_v31 }
 0x320   :  { %v2470_v35 = vrot.slane %v1918_v36, %v4506_v8  ;;  %v1927_v4 = vpop.permute.xlu0 %1926 }
 0x321   :  { %v2485_v22 = vrot.slane %v1927_v4, %v4534_v11 }
 0x322   :  { %v2471_v55 = vsel %vm2136_vm6, %v2470_v35, %v2466_v43 }
 0x323   :  { %v1924_v19 = vpop.permute.xlu1 %1923  ;;  %v2476_v26 = vsel %vm2143_vm7, %v2475_v52, %v2471_v55 }
 0x324   :  { %v2480_v40 = vrot.slane %v1924_v19, %v4522_v62  ;;  %v1933_v14 = vpop.permute.xlu0 %1932 }
 0x325   :  { %v2495_v9 = vrot.slane %v1933_v14, %v4546_v47 }
 0x326   :  { %v2481_v34 = vsel %vm2150_vm8, %v2480_v40, %v2476_v26 }
 0x327   :  { %v1930_v20 = vpop.permute.xlu1 %1929  ;;  %v2486_v46 = vsel %vm2157_vm9, %v2485_v22, %v2481_v34 }
 0x328   :  { %v2490_v15 = vrot.slane %v1930_v20, %v4538_v27  ;;  %v1939_v49 = vpop.permute.xlu0 %1938 }
 0x329   :  { %v2505_v50 = vrot.slane %v1939_v49, %v4566_v29 }
 0x32a   :  { %v2491_v45 = vsel %vm2164_vm10, %v2490_v15, %v2486_v46 }
 0x32b   :  { %v1936_v30 = vpop.permute.xlu1 %1935  ;;  %v2496_v7 = vsel %vm2171_vm11, %v2495_v9, %v2491_v45 }
 0x32c   :  { %v2500_v59 = vrot.slane %v1936_v30, %v4554_v56  ;;  %v1945_v17 = vpop.permute.xlu0 %1944 }
 0x32d   :  { %v2515_v6 = vrot.slane %v1945_v17, %v4576_v5 }
 0x32e   :  { %v2501_v10 = vsel %vm5223_vm12, %v2500_v59, %v2496_v7 }
 0x32f   :  { %v1942_v60 = vpop.permute.xlu1 %1941  ;;  %v2506_v0 = vsel %vm2185_vm13, %v2505_v50, %v2501_v10 }
 0x330   :  { %v2510_v16 = vrot.slane %v1942_v60, %v4570_v44  ;;  %v1951_v42 = vpop.permute.xlu0 %1950 }
 0x331   :  { %v2524_v48 = vrot.slane %v1951_v42, %v4471_v38 }
 0x332   :  { %v2511_v2 = vsel %vm2192_vm14, %v2510_v16, %v2506_v0 }
 0x333   :  { %v2516_v51 = vsel %vm2199_vm15, %v2515_v6, %v2511_v2  ;;  %v1948_v3 = vpop.permute.xlu1 %1947 }
 0x334   :  { %v2520_v63 = vrot.slane %v1948_v3, %v4465_v53  ;;  %v1957_v57 = vpop.permute.xlu0 %1956  ;;  %v2761_v58 = vsel %vm2760_vm0, %v2516_v51, %v2759_v61  ;;  %vm2762_vm0 = vcmask 1045509  }
 0x335   :  { %v2534_v21 = vrot.slane %v1957_v57, %v4482_v13 }
 0x336   :  { %v2525_v24 = vsel %vm2101_vm1, %v2524_v48, %v2520_v63 }
 0x337   :  { %v1954_v37 = vpop.permute.xlu1 %1953 }
 0x338   :  { %v2529_v1 = vrot.slane %v1954_v37, %v4475_v39  ;;  %v1963_v23 = vpop.permute.xlu0 %1962 }
 0x339   :  { %v2544_v31 = vrot.slane %v1963_v23, %v4502_v41 }
 0x33a   :  { %v2530_v28 = vsel %vm2108_vm2, %v2529_v1, %v2525_v24 }
 0x33b   :  { %v1960_v32 = vpop.permute.xlu1 %1959  ;;  %v2535_v33 = vsel %vm2115_vm3, %v2534_v21, %v2530_v28 }
 0x33c   :  { %v2539_v25 = vrot.slane %v1960_v32, %v4490_v18  ;;  %v1969_v12 = vpop.permute.xlu0 %1968 }
 0x33d   :  { %v2554_v52 = vrot.slane %v1969_v12, %v4514_v54 }
 0x33e   :  { %v2540_v61 = vsel %vm2122_vm4, %v2539_v25, %v2535_v33 }
 0x33f   :  { %v1966_v36 = vpop.permute.xlu1 %1965  ;;  %v2545_v43 = vsel %vm2129_vm5, %v2544_v31, %v2540_v61 }
 0x340   :  { %v2549_v35 = vrot.slane %v1966_v36, %v4506_v8  ;;  %v1975_v4 = vpop.permute.xlu0 %1974 }
 0x341   :  { %v2564_v22 = vrot.slane %v1975_v4, %v4534_v11 }
 0x342   :  { %v2550_v55 = vsel %vm2136_vm6, %v2549_v35, %v2545_v43 }
 0x343   :  { %v1972_v19 = vpop.permute.xlu1 %1971  ;;  %v2555_v26 = vsel %vm2143_vm7, %v2554_v52, %v2550_v55 }
 0x344   :  { %v2559_v40 = vrot.slane %v1972_v19, %v4522_v62  ;;  %v1981_v14 = vpop.permute.xlu0 %1980 }
 0x345   :  { %v2574_v9 = vrot.slane %v1981_v14, %v4546_v47 }
 0x346   :  { %v2560_v34 = vsel %vm2150_vm8, %v2559_v40, %v2555_v26 }
 0x347   :  { %v1978_v20 = vpop.permute.xlu1 %1977  ;;  %v2565_v46 = vsel %vm2157_vm9, %v2564_v22, %v2560_v34 }
 0x348   :  { %v2569_v15 = vrot.slane %v1978_v20, %v4538_v27  ;;  %v1987_v49 = vpop.permute.xlu0 %1986 }
 0x349   :  { %v2584_v50 = vrot.slane %v1987_v49, %v4566_v29 }
 0x34a   :  { %v2570_v45 = vsel %vm2164_vm10, %v2569_v15, %v2565_v46 }
 0x34b   :  { %v1984_v30 = vpop.permute.xlu1 %1983  ;;  %v2575_v7 = vsel %vm2171_vm11, %v2574_v9, %v2570_v45 }
 0x34c   :  { %v2579_v59 = vrot.slane %v1984_v30, %v4554_v56  ;;  %v1993_v17 = vpop.permute.xlu0 %1992 }
 0x34d   :  { %v2594_v6 = vrot.slane %v1993_v17, %v4576_v5 }
 0x34e   :  { %v2580_v10 = vsel %vm5223_vm12, %v2579_v59, %v2575_v7 }
 0x34f   :  { %v1990_v60 = vpop.permute.xlu1 %1989  ;;  %v2585_v0 = vsel %vm2185_vm13, %v2584_v50, %v2580_v10 }
 0x350   :  { %v2589_v16 = vrot.slane %v1990_v60, %v4570_v44  ;;  %v1999_v42 = vpop.permute.xlu0 %1998 }
 0x351   :  { %v2603_v52 = vrot.slane %v1999_v42, %v4471_v38 }
 0x352   :  { %v2590_v2 = vsel %vm2192_vm14, %v2589_v16, %v2585_v0 }
 0x353   :  { %v2595_v51 = vsel %vm2199_vm15, %v2594_v6, %v2590_v2  ;;  %v1996_v3 = vpop.permute.xlu1 %1995 }
 0x354   :  { %v2005_v48 = vpop.permute.xlu0 %2004  ;;  %v4827_v63 = vsel %vm2762_vm0, %v2595_v51, %v2761_v58  ;;  %v2599_v35 = vrot.slane %v1996_v3, %v4465_v53 }
 0x355   :  { %v2613_v34 = vrot.slane %v2005_v48, %v4482_v13 }
 0x356   :  { %v2604_v19 = vsel %vm2101_vm1, %v2603_v52, %v2599_v35 }
 0x357   :  { %v2002_v57 = vpop.permute.xlu1 %2001 }
 0x358   :  { %v2011_v24 = vpop.permute.xlu0 %2010  ;;  %v2608_v4 = vrot.slane %v2002_v57, %v4475_v39 }
 0x359   :  { %v2623_v59 = vrot.slane %v2011_v24, %v4502_v41 }
 0x35a   :  { %v2609_v40 = vsel %vm2108_vm2, %v2608_v4, %v2604_v19 }
 0x35b   :  { %v2008_v37 = vpop.permute.xlu1 %2007  ;;  %v2614_v49 = vsel %vm2115_vm3, %v2613_v34, %v2609_v40 }
 0x35c   :  { %v2017_v1 = vpop.permute.xlu0 %2016  ;;  %v2618_v14 = vrot.slane %v2008_v37, %v4490_v18 }
 0x35d   :  { %v2633_v42 = vrot.slane %v2017_v1, %v4514_v54 }
 0x35e   :  { %v2619_v45 = vsel %vm2122_vm4, %v2618_v14, %v2614_v49 }
 0x35f   :  { %v2014_v23 = vpop.permute.xlu1 %2013 }
 0x360   :  { %v2023_v21 = vpop.permute.xlu0 %2022  ;;  %v2628_v30 = vrot.slane %v2014_v23, %v4506_v8 }
 0x361   :  { %v2643_v37 = vrot.slane %v2023_v21, %v4534_v11 }
 0x363   :  { %v2020_v28 = vpop.permute.xlu1 %2019 }
 0x364   :  { %v4829_v32 = vpop.permute.xlu0 %2028  ;;  %v2638_v0 = vrot.slane %v2020_v28, %v4522_v62 }
 0x367   :  { %v2026_v33 = vpop.permute.xlu1 %2025 }
 0x368   :  { %v2047_v25 = vpop.permute.xlu0 %2046  ;;  %v2648_v57 = vrot.slane %v2026_v33, %v4538_v27 }
 0x369   :  { %v2682_v46 = vrot.slane %v2047_v25, %v4471_v38  ;;  %v2624_v38 = vsel %vm2129_vm5, %v2623_v59, %v2619_v45 }
 0x36a   :  { %v2629_v60 = vsel %vm2136_vm6, %v2628_v30, %v2624_v38 }
 0x36b   :  { %v2044_v12 = vpop.permute.xlu1 %2043 }
 0x36c   :  { %v2053_v31 = vpop.permute.xlu0 %2052  ;;  %v2678_v22 = vrot.slane %v2044_v12, %v4465_v53 }
 0x36e   :  { %v2683_v7 = vsel %vm2101_vm1, %v2682_v46, %v2678_v22  ;;  %vm5228_vm1 = vmmov %vm5223_vm12 }
 0x36f   :  { %v2050_v61 = vpop.permute.xlu1 %2049 }
 0x370   :  { %v2059_v36 = vpop.permute.xlu0 %2058  ;;  %v2687_v20 = vrot.slane %v2050_v61, %v4475_v39  ;;  %v2692_v39 = vrot.slane %v2053_v31, %v4482_v13  ;;  %v2634_v13 = vsel %vm2143_vm7, %v2633_v42, %v2629_v60  ;;  %v2653_v61 = vrot.slane %v4829_v32, %v4546_v47 }
 0x371   :  { %v2639_v48 = vsel %vm2150_vm8, %v2638_v0, %v2634_v13 }
 0x372   :  { %v2688_v53 = vsel %vm2108_vm2, %v2687_v20, %v2683_v7  ;;  %vm5229_vm2 = vmmov %vm5228_vm1 }
 0x373   :  { %v2056_v43 = vpop.permute.xlu1 %2055  ;;  %v2693_v16 = vsel %vm2115_vm3, %v2692_v39, %v2688_v53  ;;  %vm2764_vm3 = vcmask 1046534  }
 0x374   :  { %v2065_v58 = vpop.permute.xlu0 %2064  ;;  %v2697_v17 = vrot.slane %v2056_v43, %v4490_v18  ;;  %v2702_v18 = vrot.slane %v2059_v36, %v4502_v41  ;;  %v2644_v41 = vsel %vm2157_vm9, %v2643_v37, %v2639_v48 }
 0x375   :  { %v2649_v12 = vsel %vm2164_vm10, %v2648_v57, %v2644_v41 }
 0x376   :  { %v2698_v6 = vsel %vm2122_vm4, %v2697_v17, %v2693_v16  ;;  %v2654_v4 = vsel %vm2171_vm11, %v2653_v61, %v2649_v12  ;;  %vm2766_vm4 = vcmask 1047559  }
 0x377   :  { %v2062_v55 = vpop.permute.xlu1 %2061  ;;  %v2703_v24 = vsel %vm2129_vm5, %v2702_v18, %v2698_v6 }
 0x378   :  { %v2071_v26 = vpop.permute.xlu0 %2070  ;;  %v2707_v2 = vrot.slane %v2062_v55, %v4506_v8  ;;  %v2712_v8 = vrot.slane %v2065_v58, %v4514_v54 }
 0x379   :  { %v2722_v54 = vrot.slane %v2071_v26, %v4534_v11 }
 0x37a   :  { %v2708_v1 = vsel %vm2136_vm6, %v2707_v2, %v2703_v24 }
 0x37b   :  { %v2068_v15 = vpop.permute.xlu1 %2067  ;;  %v2713_v31 = vsel %vm2143_vm7, %v2712_v8, %v2708_v1 }
 0x37c   :  { %v2032_v9 = vpop.permute.xlu0 %2031  ;;  %v2717_v23 = vrot.slane %v2068_v15, %v4522_v62 }
 0x37d   :  { %v2658_v33 = vrot.slane %v2032_v9, %v4554_v56 }
 0x37e   :  { %v2718_v21 = vsel %vm2150_vm8, %v2717_v23, %v2713_v31 }
 0x37f   :  { %v2074_v50 = vpop.permute.xlu1 %2073  ;;  %v2659_v32 = vsel %vm5228_vm1, %v2658_v33, %v2654_v4  ;;  %v2723_v19 = vsel %vm2157_vm9, %v2722_v54, %v2718_v21 }
 0x380   :  { %v2035_v10 = vpop.permute.xlu0 %2034  ;;  %v2727_v36 = vrot.slane %v2074_v50, %v4538_v27 }
 0x381   :  { %v2663_v62 = vrot.slane %v2035_v10, %v4566_v29 }
 0x382   :  { %v2728_v40 = vsel %vm2164_vm10, %v2727_v36, %v2723_v19 }
 0x383   :  { %v2077_v51 = vpop.permute.xlu1 %2076  ;;  %v2664_v11 = vsel %vm2185_vm13, %v2663_v62, %v2659_v32 }
 0x384   :  { %v2038_v3 = vpop.permute.xlu0 %2037  ;;  %v2732_v43 = vrot.slane %v2077_v51, %v4546_v47 }
 0x385   :  { %v2668_v35 = vrot.slane %v2038_v3, %v4570_v44 }
 0x386   :  { %v2733_v26 = vsel %vm2171_vm11, %v2732_v43, %v2728_v40 }
 0x387   :  { %v2080_v28 = vpop.permute.xlu1 %2079  ;;  %v2669_v14 = vsel %vm2192_vm14, %v2668_v35, %v2664_v11 }
 0x388   :  { %v2041_v25 = vpop.permute.xlu0 %2040  ;;  %v2737_v52 = vrot.slane %v2080_v28, %v4554_v56 }
 0x389   :  { %v2673_v55 = vrot.slane %v2041_v25, %v4576_v5 }
 0x38a   :  { %v2738_v56 = vsel %vm5229_vm2, %v2737_v52, %v2733_v26 }
 0x38b   :  { %v2083_v58 = vpop.permute.xlu1 %2082  ;;  %v2674_v34 = vsel %vm2199_vm15, %v2673_v55, %v2669_v14 }
 0x38c   :  { %v2742_v27 = vrot.slane %v2083_v58, %v4566_v29  ;;  %v2089_v47 = vpop.permute.xlu0 %2088  ;;  %v2765_v9 = vsel %vm2764_vm3, %v2674_v34, %v4827_v63 }
 0x38d   :  { %v2752_v46 = vrot.slane %v2089_v47, %v4576_v5 }
 0x38e   :  { %v2743_v29 = vsel %vm2185_vm13, %v2742_v27, %v2738_v56 }
 0x38f   :  { %v2086_v22 = vpop.permute.xlu1 %2085 }
 0x390   :  { %v2747_v20 = vrot.slane %v2086_v22, %v4570_v44 }
 0x392   :  { %v2748_v15 = vsel %vm2192_vm14, %v2747_v20, %v2743_v29 }
 0x393   :  { %v2753_v49 = vsel %vm2199_vm15, %v2752_v46, %v2748_v15 }
 0x394   :  { %v2767_v45 = vsel %vm2766_vm4, %v2753_v49, %v2765_v9 }
 0x395   :  { %2769 = vst [vmem:[#allocation2] sm:$0xff] %v2767_v45 }
 0x396   :  { %2799 = shalt.err (!%p2796_p4)
}
 0x397   :  { %2779 = dma.vmem_to_hbm [thread:$0]  %s2777_s11, 128, %s4901_s3, [#allocation3]  }
 0x398   :  { %2808 = dma.done.wait [#allocation3], 128  }
 0x399   :  { %2809 = vsyncadd [#allocation3], 4294967168 }
 0x39a   :  { %2783 = vsyncpa [#allocation3], 1 }

</bundles_post_ra>
